<compile_context>
chip_gen: v7x
topology: tpu7x:2x2x1
jax: 0.10.0
libtpu: 0.0.40
codegen_flags: <defaults>
</compile_context>

<pallas_src>
import functools

import jax
import jax.numpy as jnp
from jax import lax
from jax.experimental import pallas as pl
from jax.experimental.pallas import tpu as pltpu


def _conf_out_kernel(xm_ref, xt_ref, xb_ref, w1_ref, b1_ref, w2_ref, b2_ref,
                     out_ref, *, TH, W, Cin, Cmid):
    # xm_ref : (1, TH, W, Cin) bf16   main row tile (unpadded)
    # xt_ref : (1, 1,  W, Cin) bf16   row above the tile (clamped at top edge)
    # xb_ref : (1, 1,  W, Cin) bf16   row below the tile (clamped at bottom edge)
    # w1_ref : (3, 3*Cin, Cmid) bf16  folded 3x3 taps: [kw, kh*Cin + cin, cout]
    # b1_ref : (1, Cmid) f32
    # w2_ref : (1, Cmid) f32          1x1 conv weights (Cmid -> 1)
    # b2_ref : (1, 1)    f32
    # out_ref: (1, TH, W)             sigmoid output, channel dim squeezed
    h = pl.program_id(1)
    last = pl.num_programs(1) - 1

    xm = xm_ref[0]                                            # (TH, W, Cin)
    top_row = xt_ref[0]
    bot_row = xb_ref[0]
    top = jnp.where(h == 0, jnp.zeros_like(top_row), top_row)     # SAME top pad
    bot = jnp.where(h == last, jnp.zeros_like(bot_row), bot_row)  # SAME bottom pad

    # Row windows for the three kh taps (output row t reads rows t-1, t, t+1).
    r0 = jnp.concatenate([top, xm[:TH - 1]], axis=0)          # (TH, W, Cin)
    r2 = jnp.concatenate([xm[1:], bot], axis=0)               # (TH, W, Cin)

    # K-fold: stack the kh taps along channels once -> contraction dim 3*Cin.
    s = jnp.concatenate([r0, xm, r2], axis=-1)                # (TH, W, 3*Cin)

    K = 3 * Cin
    acc = jnp.broadcast_to(b1_ref[...], (TH * W, Cmid)).astype(jnp.float32)

    # kw = 1 (center columns): no shift, use `s` directly (no extra copy).
    acc = acc + jnp.dot(s.reshape(TH * W, K), w1_ref[1],
                        preferred_element_type=jnp.float32)
    # kw = 0 (columns w-1): shift right by one, zero the left edge column.
    zcol = jnp.zeros((TH, 1, K), s.dtype)
    a = jnp.concatenate([zcol, s[:, :W - 1, :]], axis=1)
    acc = acc + jnp.dot(a.reshape(TH * W, K), w1_ref[0],
                        preferred_element_type=jnp.float32)
    # kw = 2 (columns w+1): shift left by one, zero the right edge column.
    a = jnp.concatenate([s[:, 1:, :], zcol], axis=1)
    acc = acc + jnp.dot(a.reshape(TH * W, K), w1_ref[2],
                        preferred_element_type=jnp.float32)

    # TODO(synk): activation assumed to be nn.ReLU() (standard MiDaS/ZoeDepth
    # instantiation); a different `activation` arg would replace this maximum.
    acc = jnp.maximum(acc, 0.0)

    # conv2 (1x1, Cmid -> 1) + bias as a lane reduction, sigmoid via EUP exp +
    # approx reciprocal (no f32 divide).
    hid = acc.reshape(TH, W, Cmid)
    z = jnp.sum(hid * w2_ref[...], axis=-1) + b2_ref[...]     # (TH, W) f32
    out_ref[0] = pl.reciprocal(1.0 + jnp.exp(-z),
                               approx=True).astype(out_ref.dtype)


def conf_output_conv(x_nchw, w1_hwio, b1, w2_hwio, b2, *, out_dtype=jnp.float32):
    """ConfOutputConvInterpolation.forward.

    x_nchw : (N, Cin, H, W) float32
    w1_hwio: (3, 3, Cin, 32) conv1 weights (HWIO == torch OIHW.transpose(2,3,1,0))
    b1     : (32,)
    w2_hwio: (1, 1, 32, 1)   conv2 (1x1) weights
    b2     : (1,)
    returns: (N, 1, H, W) out_dtype
    """
    N, Cin, H, W = x_nchw.shape
    Cmid = w1_hwio.shape[-1]

    # Glue: NCHW -> NHWC + bf16 cast (one fused HBM pass; MXU-native dtype).
    x = jnp.transpose(x_nchw, (0, 2, 3, 1)).astype(jnp.bfloat16)

    # Rows padded up to a multiple of 8 (zero rows behave exactly like the SAME
    # padding; extra output rows are sliced off) so odd H never crashes and the
    # output block always obeys the (8, 128) rule.
    Hp = ((H + 7) // 8) * 8
    if Hp != H:
        x = jnp.pad(x, ((0, 0), (0, Hp - H), (0, 0), (0, 0)))

    # Row-tile height: largest of 32/16/8 dividing Hp, preferring n_h >= 2 so
    # both v7x TensorCores stay busy even at N == 1.
    candidates = [t for t in (32, 16, 8) if Hp % t == 0]
    multi = [t for t in candidates if Hp // t >= 2]
    TH = (multi or candidates)[0]
    n_h = Hp // TH

    # Fold the 3x3 weights for the K = 3*Cin contraction:
    #   w1f[kw, kh*Cin + cin, cout] = w1_hwio[kh, kw, cin, cout]
    w1f = jnp.transpose(w1_hwio, (1, 0, 2, 3)).reshape(3, 3 * Cin, Cmid)
    w1f = w1f.astype(jnp.bfloat16)
    b1r = b1.reshape(1, Cmid).astype(jnp.float32)
    w2r = w2_hwio.reshape(1, Cmid).astype(jnp.float32)
    b2r = b2.reshape(1, 1).astype(jnp.float32)

    kernel = functools.partial(_conf_out_kernel, TH=TH, W=W, Cin=Cin, Cmid=Cmid)

    out_nhw = pl.pallas_call(
        kernel,
        out_shape=jax.ShapeDtypeStruct((N, Hp, W), out_dtype),
        grid_spec=pltpu.PrefetchScalarGridSpec(
            num_scalar_prefetch=0,
            grid=(N, n_h),
            in_specs=[
                # main row tile: rows [h*TH, h*TH + TH)
                pl.BlockSpec((1, TH, W, Cin), lambda n, h: (n, h, 0, 0)),
                # 1-row top halo (clamped; zeroed in-kernel at the top edge)
                pl.BlockSpec((1, 1, W, Cin),
                             lambda n, h: (n, jnp.maximum(h * TH - 1, 0), 0, 0)),
                # 1-row bottom halo (clamped; zeroed in-kernel at the bottom edge)
                pl.BlockSpec((1, 1, W, Cin),
                             lambda n, h: (n, jnp.minimum((h + 1) * TH, Hp - 1), 0, 0)),
                # weights / biases: constant block index -> fetched once
                pl.BlockSpec((3, 3 * Cin, Cmid), lambda n, h: (0, 0, 0)),
                pl.BlockSpec((1, Cmid), lambda n, h: (0, 0)),
                pl.BlockSpec((1, Cmid), lambda n, h: (0, 0)),
                pl.BlockSpec((1, 1), lambda n, h: (0, 0)),
            ],
            out_specs=pl.BlockSpec((1, TH, W), lambda n, h: (n, h, 0)),
        ),
        compiler_params=pltpu.CompilerParams(
            dimension_semantics=("parallel", "parallel"),
            vmem_limit_bytes=64 * 1024 * 1024),
    )(x, x, x, w1f, b1r, w2r, b2r)

    if Hp != H:
        out_nhw = out_nhw[:, :H, :]
    return out_nhw[:, None, :, :]


def _reference(x_nchw, w1_hwio, b1, w2_hwio, b2):
    x = jnp.transpose(x_nchw, (0, 2, 3, 1))
    dn = ("NHWC", "HWIO", "NHWC")
    y = lax.conv_general_dilated(x, w1_hwio, (1, 1), "SAME",
                                 dimension_numbers=dn) + b1
    y = jax.nn.relu(y)
    y = lax.conv_general_dilated(y, w2_hwio, (1, 1), "SAME",
                                 dimension_numbers=dn) + b2
    y = jax.nn.sigmoid(y)
    return jnp.transpose(y, (0, 3, 1, 2))


if __name__ == "__main__":
    # activation == nn.ReLU(); deterministic synthetic parameters.
    N, Cin, H, W = 2, 4, 16, 16
    Cmid = 32
    key = jax.random.PRNGKey(0)
    kx, kw1, kb1, kw2, kb2 = jax.random.split(key, 5)

    x = jax.random.normal(kx, (N, Cin, H, W), jnp.float32)
    w1 = jax.random.normal(kw1, (3, 3, Cin, Cmid), jnp.float32) * 0.1   # HWIO
    b1 = jax.random.normal(kb1, (Cmid,), jnp.float32) * 0.1
    w2 = jax.random.normal(kw2, (1, 1, Cmid, 1), jnp.float32) * 0.1     # HWIO
    b2 = jax.random.normal(kb2, (1,), jnp.float32) * 0.1

    out = conf_output_conv(x, w1, b1, w2, b2)
    jax.block_until_ready(out)

    ref = _reference(x, w1, b1, w2, b2)
    assert out.shape == (N, 1, H, W)
    # bf16 matmul operands (f32 accumulate) vs an f32 reference -> 1e-2 tolerance.
    assert jnp.allclose(out, ref, atol=1e-2, rtol=1e-2), "mismatch vs reference"

    print("KERNEL_OK")
</pallas_src>

<mosaic_0001>
module attributes {stable_mosaic.version = 11 : i64} {
  func.func @_conf_out_kernel(%arg0: i32, %arg1: i32, %arg2: memref<1x8x16x4xbf16, #tpu.memory_space<vmem>>, %arg3: memref<1x1x16x4xbf16, #tpu.memory_space<vmem>>, %arg4: memref<1x1x16x4xbf16, #tpu.memory_space<vmem>>, %arg5: memref<3x12x32xbf16, #tpu.memory_space<vmem>>, %arg6: memref<1x32xf32, #tpu.memory_space<vmem>>, %arg7: memref<1x32xf32, #tpu.memory_space<vmem>>, %arg8: memref<1x1xf32, #tpu.memory_space<vmem>>, %arg9: memref<1x8x16xf32, #tpu.memory_space<vmem>>) attributes {dimension_semantics = [#tpu.dimension_semantics<parallel>, #tpu.dimension_semantics<parallel>], iteration_bounds = array<i64: 2, 2>, scalar_prefetch = 0 : i64, scratch_operands = 0 : i64, tpu.core_type = #tpu.core_type<tc>, window_params = [{transform_indices = @transform_0, window_bounds = array<i64: 1, 8, 16, 4>}, {transform_indices = @transform_1, window_bounds = array<i64: 1, 1, 16, 4>}, {transform_indices = @transform_2, window_bounds = array<i64: 1, 1, 16, 4>}, {pipeline_mode = #tpu.pipeline_mode<synchronous>, transform_indices = @transform_3, window_bounds = array<i64: 3, 12, 32>}, {pipeline_mode = #tpu.pipeline_mode<synchronous>, transform_indices = @transform_4, window_bounds = array<i64: 1, 32>}, {pipeline_mode = #tpu.pipeline_mode<synchronous>, transform_indices = @transform_5, window_bounds = array<i64: 1, 32>}, {pipeline_mode = #tpu.pipeline_mode<synchronous>, transform_indices = @transform_6, window_bounds = array<i64: 1, 1>}, {transform_indices = @transform_7, window_bounds = array<i64: 1, 8, 16>}]} {
    %c0 = arith.constant 0 : index
    %c0_0 = arith.constant 0 : index
    %c0_1 = arith.constant 0 : index
    %c0_2 = arith.constant 0 : index
    %0 = vector.load %arg2[%c0, %c0_0, %c0_1, %c0_2] : memref<1x8x16x4xbf16, #tpu.memory_space<vmem>>, vector<1x8x16x4xbf16>
    %1 = vector.shape_cast %0 : vector<1x8x16x4xbf16> to vector<8x16x4xbf16>
    %c0_3 = arith.constant 0 : index
    %c0_4 = arith.constant 0 : index
    %c0_5 = arith.constant 0 : index
    %c0_6 = arith.constant 0 : index
    %2 = vector.load %arg3[%c0_3, %c0_4, %c0_5, %c0_6] : memref<1x1x16x4xbf16, #tpu.memory_space<vmem>>, vector<1x1x16x4xbf16>
    %3 = vector.shape_cast %2 : vector<1x1x16x4xbf16> to vector<1x16x4xbf16>
    %c0_7 = arith.constant 0 : index
    %c0_8 = arith.constant 0 : index
    %c0_9 = arith.constant 0 : index
    %c0_10 = arith.constant 0 : index
    %4 = vector.load %arg4[%c0_7, %c0_8, %c0_9, %c0_10] : memref<1x1x16x4xbf16, #tpu.memory_space<vmem>>, vector<1x1x16x4xbf16>
    %5 = vector.shape_cast %4 : vector<1x1x16x4xbf16> to vector<1x16x4xbf16>
    %c0_i32 = arith.constant 0 : i32
    %6 = arith.cmpi eq, %arg1, %c0_i32 : i32
    %cst = arith.constant 0.000000e+00 : bf16
    %7 = vector.broadcast %cst : bf16 to vector<1x16x4xbf16>
    %8 = arith.select %6, %7, %3 : vector<1x16x4xbf16>
    %c1_i32 = arith.constant 1 : i32
    %9 = arith.cmpi eq, %arg1, %c1_i32 : i32
    %cst_11 = arith.constant 0.000000e+00 : bf16
    %10 = vector.broadcast %cst_11 : bf16 to vector<1x16x4xbf16>
    %11 = arith.select %9, %10, %5 : vector<1x16x4xbf16>
    %12 = vector.extract_strided_slice %1 {offsets = [0, 0, 0], sizes = [7, 16, 4], strides = [1, 1, 1]} : vector<8x16x4xbf16> to vector<7x16x4xbf16>
    %13 = tpu.concatenate %8, %12 in 0 : vector<1x16x4xbf16>, vector<7x16x4xbf16> -> vector<8x16x4xbf16>
    %14 = vector.extract_strided_slice %1 {offsets = [1, 0, 0], sizes = [7, 16, 4], strides = [1, 1, 1]} : vector<8x16x4xbf16> to vector<7x16x4xbf16>
    %15 = tpu.concatenate %14, %11 in 0 : vector<7x16x4xbf16>, vector<1x16x4xbf16> -> vector<8x16x4xbf16>
    %16 = tpu.concatenate %13, %1, %15 in 2 : vector<8x16x4xbf16>, vector<8x16x4xbf16>, vector<8x16x4xbf16> -> vector<8x16x12xbf16>
    %c0_12 = arith.constant 0 : index
    %c0_13 = arith.constant 0 : index
    %17 = vector.load %arg6[%c0_12, %c0_13] : memref<1x32xf32, #tpu.memory_space<vmem>>, vector<1x32xf32>
    %18 = vector.shape_cast %17 : vector<1x32xf32> to vector<1x32xf32>
    %19 = vector.broadcast %18 : vector<1x32xf32> to vector<128x32xf32>
    %20 = vector.shape_cast %16 : vector<8x16x12xbf16> to vector<128x12xbf16>
    %c1 = arith.constant 1 : index
    %c0_14 = arith.constant 0 : index
    %c0_15 = arith.constant 0 : index
    %21 = vector.load %arg5[%c1, %c0_14, %c0_15] : memref<3x12x32xbf16, #tpu.memory_space<vmem>>, vector<1x12x32xbf16>
    %22 = vector.shape_cast %21 : vector<1x12x32xbf16> to vector<12x32xbf16>
    %cst_16 = arith.constant dense<0.000000e+00> : vector<128x32xf32>
    %23 = tpu.matmul %20, %22, %cst_16 {dimension_numbers = #tpu.dot_dimension_numbers<[1], [0], [0], [1], [0, 0, 1, 1], [], []>} : vector<128x12xbf16>, vector<12x32xbf16>, vector<128x32xf32> -> vector<128x32xf32>
    %24 = arith.addf %19, %23 : vector<128x32xf32>
    %cst_17 = arith.constant 0.000000e+00 : bf16
    %25 = vector.broadcast %cst_17 : bf16 to vector<8x1x12xbf16>
    %26 = vector.extract_strided_slice %16 {offsets = [0, 0, 0], sizes = [8, 15, 12], strides = [1, 1, 1]} : vector<8x16x12xbf16> to vector<8x15x12xbf16>
    %27 = tpu.concatenate %25, %26 in 1 : vector<8x1x12xbf16>, vector<8x15x12xbf16> -> vector<8x16x12xbf16>
    %28 = vector.shape_cast %27 : vector<8x16x12xbf16> to vector<128x12xbf16>
    %c0_18 = arith.constant 0 : index
    %c0_19 = arith.constant 0 : index
    %c0_20 = arith.constant 0 : index
    %29 = vector.load %arg5[%c0_18, %c0_19, %c0_20] : memref<3x12x32xbf16, #tpu.memory_space<vmem>>, vector<1x12x32xbf16>
    %30 = vector.shape_cast %29 : vector<1x12x32xbf16> to vector<12x32xbf16>
    %cst_21 = arith.constant dense<0.000000e+00> : vector<128x32xf32>
    %31 = tpu.matmul %28, %30, %cst_21 {dimension_numbers = #tpu.dot_dimension_numbers<[1], [0], [0], [1], [0, 0, 1, 1], [], []>} : vector<128x12xbf16>, vector<12x32xbf16>, vector<128x32xf32> -> vector<128x32xf32>
    %32 = arith.addf %24, %31 : vector<128x32xf32>
    %33 = vector.extract_strided_slice %16 {offsets = [0, 1, 0], sizes = [8, 15, 12], strides = [1, 1, 1]} : vector<8x16x12xbf16> to vector<8x15x12xbf16>
    %34 = tpu.concatenate %33, %25 in 1 : vector<8x15x12xbf16>, vector<8x1x12xbf16> -> vector<8x16x12xbf16>
    %35 = vector.shape_cast %34 : vector<8x16x12xbf16> to vector<128x12xbf16>
    %c2 = arith.constant 2 : index
    %c0_22 = arith.constant 0 : index
    %c0_23 = arith.constant 0 : index
    %36 = vector.load %arg5[%c2, %c0_22, %c0_23] : memref<3x12x32xbf16, #tpu.memory_space<vmem>>, vector<1x12x32xbf16>
    %37 = vector.shape_cast %36 : vector<1x12x32xbf16> to vector<12x32xbf16>
    %cst_24 = arith.constant dense<0.000000e+00> : vector<128x32xf32>
    %38 = tpu.matmul %35, %37, %cst_24 {dimension_numbers = #tpu.dot_dimension_numbers<[1], [0], [0], [1], [0, 0, 1, 1], [], []>} : vector<128x12xbf16>, vector<12x32xbf16>, vector<128x32xf32> -> vector<128x32xf32>
    %39 = arith.addf %32, %38 : vector<128x32xf32>
    %cst_25 = arith.constant 0.000000e+00 : f32
    %40 = vector.broadcast %cst_25 : f32 to vector<128x32xf32>
    %41 = arith.maximumf %39, %40 : vector<128x32xf32>
    %42 = vector.shape_cast %41 : vector<128x32xf32> to vector<8x16x32xf32>
    %c0_26 = arith.constant 0 : index
    %c0_27 = arith.constant 0 : index
    %43 = vector.load %arg7[%c0_26, %c0_27] : memref<1x32xf32, #tpu.memory_space<vmem>>, vector<1x32xf32>
    %44 = vector.shape_cast %43 : vector<1x32xf32> to vector<1x1x32xf32>
    %45 = vector.broadcast %44 : vector<1x1x32xf32> to vector<8x16x32xf32>
    %46 = arith.mulf %42, %45 : vector<8x16x32xf32>
    %cst_28 = arith.constant dense<0.000000e+00> : vector<8x16xf32>
    %47 = vector.multi_reduction <add>, %46, %cst_28 [2] : vector<8x16x32xf32> to vector<8x16xf32>
    %c0_29 = arith.constant 0 : index
    %c0_30 = arith.constant 0 : index
    %48 = vector.load %arg8[%c0_29, %c0_30] : memref<1x1xf32, #tpu.memory_space<vmem>>, vector<1x1xf32>
    %49 = vector.broadcast %48 : vector<1x1xf32> to vector<8x16xf32>
    %50 = arith.addf %47, %49 : vector<8x16xf32>
    %cst_31 = arith.constant 0.000000e+00 : f32
    %51 = vector.broadcast %cst_31 : f32 to vector<8x16xf32>
    %52 = arith.subf %51, %50 : vector<8x16xf32>
    %53 = math.exp %52 : vector<8x16xf32>
    %cst_32 = arith.constant 1.000000e+00 : f32
    %54 = vector.broadcast %cst_32 : f32 to vector<8x16xf32>
    %55 = arith.addf %54, %53 : vector<8x16xf32>
    %56 = tpu.reciprocal %55 {approx = true} : vector<8x16xf32> -> vector<8x16xf32>
    %c0_33 = arith.constant 0 : index
    %c0_34 = arith.constant 0 : index
    %c0_35 = arith.constant 0 : index
    %57 = vector.load %arg9[%c0_33, %c0_34, %c0_35] : memref<1x8x16xf32, #tpu.memory_space<vmem>>, vector<1x8x16xf32>
    %58 = vector.shape_cast %57 : vector<1x8x16xf32> to vector<8x16xf32>
    %59 = vector.shape_cast %56 : vector<8x16xf32> to vector<1x8x16xf32>
    tpu.vector_store %arg9[%c0_33, %c0_34, %c0_35], %59 {strides = array<i32>} : memref<1x8x16xf32, #tpu.memory_space<vmem>>, vector<1x8x16xf32>,
    return
  }
  func.func @transform_0(%arg0: i32, %arg1: i32) -> (i32, i32, i32, i32) {
    %c0_i32 = arith.constant 0 : i32
    %c0_i32_0 = arith.constant 0 : i32
    %c0_i32_1 = arith.constant 0 : i32
    return %arg0, %arg1, %c0_i32, %c0_i32_0 : i32, i32, i32, i32
  }
  func.func @transform_1(%arg0: i32, %arg1: i32) -> (i32, i32, i32, i32) {
    %c8_i32 = arith.constant 8 : i32
    %0 = arith.muli %arg1, %c8_i32 : i32
    %c1_i32 = arith.constant 1 : i32
    %1 = arith.subi %0, %c1_i32 : i32
    %c0_i32 = arith.constant 0 : i32
    %2 = arith.maxsi %1, %c0_i32 : i32
    %c0_i32_0 = arith.constant 0 : i32
    %c0_i32_1 = arith.constant 0 : i32
    %c0_i32_2 = arith.constant 0 : i32
    return %arg0, %2, %c0_i32_0, %c0_i32_1 : i32, i32, i32, i32
  }
  func.func @transform_2(%arg0: i32, %arg1: i32) -> (i32, i32, i32, i32) {
    %c1_i32 = arith.constant 1 : i32
    %0 = arith.addi %arg1, %c1_i32 : i32
    %c8_i32 = arith.constant 8 : i32
    %1 = arith.muli %0, %c8_i32 : i32
    %c15_i32 = arith.constant 15 : i32
    %2 = arith.minsi %1, %c15_i32 : i32
    %c0_i32 = arith.constant 0 : i32
    %c0_i32_0 = arith.constant 0 : i32
    %c0_i32_1 = arith.constant 0 : i32
    return %arg0, %2, %c0_i32, %c0_i32_0 : i32, i32, i32, i32
  }
  func.func @transform_3(%arg0: i32, %arg1: i32) -> (i32, i32, i32) {
    %c0_i32 = arith.constant 0 : i32
    %c0_i32_0 = arith.constant 0 : i32
    %c0_i32_1 = arith.constant 0 : i32
    %c0_i32_2 = arith.constant 0 : i32
    return %c0_i32, %c0_i32_0, %c0_i32_1 : i32, i32, i32
  }
  func.func @transform_4(%arg0: i32, %arg1: i32) -> (i32, i32) {
    %c0_i32 = arith.constant 0 : i32
    %c0_i32_0 = arith.constant 0 : i32
    %c0_i32_1 = arith.constant 0 : i32
    return %c0_i32, %c0_i32_0 : i32, i32
  }
  func.func @transform_5(%arg0: i32, %arg1: i32) -> (i32, i32) {
    %c0_i32 = arith.constant 0 : i32
    %c0_i32_0 = arith.constant 0 : i32
    %c0_i32_1 = arith.constant 0 : i32
    return %c0_i32, %c0_i32_0 : i32, i32
  }
  func.func @transform_6(%arg0: i32, %arg1: i32) -> (i32, i32) {
    %c0_i32 = arith.constant 0 : i32
    %c0_i32_0 = arith.constant 0 : i32
    %c0_i32_1 = arith.constant 0 : i32
    return %c0_i32, %c0_i32_0 : i32, i32
  }
  func.func @transform_7(%arg0: i32, %arg1: i32) -> (i32, i32, i32) {
    %c0_i32 = arith.constant 0 : i32
    %c0_i32_0 = arith.constant 0 : i32
    return %arg0, %arg1, %c0_i32 : i32, i32, i32
  }
}

</mosaic_0001>

<bundles_post_ra>
// kernel: tpu_custom_call.1
= control target key start
LH: loop header
LB: loop body
LE: loop exit
PB: predicated region body
PF: predicated region fallthrough
CT: control target
= control target key end

     0   :  { %s3303_s0 = inlined_call_operand.hbm [shape: bf16[2,16,16,4], index: 0, kind: input, shape index: {}]   ;;  %s3304_s1 = inlined_call_operand.hbm [shape: bf16[2,16,16,4], index: 1, kind: input, shape index: {}]   ;;  %s3305_s2 = inlined_call_operand.hbm [shape: bf16[2,16,16,4], index: 2, kind: input, shape index: {}]   ;;  %s3306_s3 = inlined_call_operand.hbm [shape: bf16[3,12,32], index: 3, kind: input, shape index: {}]   ;;  %s3307_s4 = inlined_call_operand.hbm [shape: f32[1,32], index: 4, kind: input, shape index: {}]   ;;  %s3308_s5 = inlined_call_operand.hbm [shape: f32[1,32], index: 5, kind: input, shape index: {}]   ;;  %s3309_s6 = inlined_call_operand.<no memory space> [shape: f32[1,1], index: 6, kind: input, shape index: {}]   ;;  %s3310_s7 = inlined_call_operand.hbm [shape: f32[2,16,16], index: 7, kind: output, shape index: {}]  }
   0x1   :  { %3342 = sst [smem:[#allocation36_spill]] %s3303_s0  ;;  %v12_v0 = vstv %s3309_s6 }
   0x2   :  { %3343 = sst [smem:[#allocation37_spill]] %s3304_s1  ;;  %13 = vst [vmem:[#allocation2] sm:$0x1] %v12_v0 }
   0x3   :  { %3344 = sst [smem:[#allocation38_spill]] %s3305_s2 }
   0x4   :  { %3345 = sst [smem:[#allocation39_spill]] %s3306_s3 }
   0x5   :  { %3346 = sst [smem:[#allocation40_spill]] %s3307_s4 }
   0x6   :  { %3347 = sst [smem:[#allocation41_spill]] %s3308_s5 }
   0x7   :  { %3348 = sst [smem:[#allocation42_spill]] %s3310_s7 }
   0x8   :  { %14 = vsyncpa [#allocation4], 0 }
   0x9   :  { %16 = vsyncpa [#allocation4 + $0x1], 0 }
   0xa   :  { %17 = vsyncpa [#allocation7], 0 }
   0xb   :  { %19 = vsyncpa [#allocation7 + $0x1], 0 }
   0xc   :  { %20 = vsyncpa [#allocation10], 0 }
   0xd   :  { %21 = vsyncpa [#allocation13], 0 }
   0xe   :  { %22 = vsyncpa [#allocation5], 0 }
   0xf   :  { %24 = vsyncpa [#allocation5 + $0x1], 0  ;;  %s2528_s26 = smov 0   ;;  %s2530_s27 = smov 0  }
  0x10   :  { %s2532_s28 = smov 0   ;;  %s2534_s29 = smov 0  }
  0x11   :  { %s2536_s30 = smov 0   ;;  %s2538_s6 = smov 0  }
  0x12   :  { %s2540_s8 = smov 0   ;;  %s2542_s9 = smov 0  }
  0x13   :  { %s2544_s10 = smov 0   ;;  %s2546_s11 = smov 0  }
  0x14   :  { %s2548_s12 = smov 0   ;;  %s2550_s13 = smov 0  }
  0x15   :  { %s2552_s14 = smov 0   ;;  %s2554_s15 = smov 0  }
  0x16 LB: > { %3349 = sst [smem:[#allocation21_spill]] %s2419_s26  ;;  %s2599_s16 = sadd.s32 4294967295, %s2471_s15   ;;  %s2471_s15 = sphi %s2554_s15, %s30_s15   ;;  %s2467_s14 = sphi %s2552_s14, %s3440_s14   ;;  %s2463_s13 = sphi %s2550_s13, %s3429_s13   ;;  %s2459_s12 = sphi %s2548_s12, %s3439_s12   ;;  %s2455_s11 = sphi %s2546_s11, %s3427_s11   ;;  %s2451_s10 = sphi %s2544_s10, %s3438_s10   ;;  %s2447_s9 = sphi %s2542_s9, %s3437_s9   ;;  %s2443_s8 = sphi %s2540_s8, %s3436_s8   ;;  %s2439_s6 = sphi %s2538_s6, %s3435_s6   ;;  %s2435_s30 = sphi %s2536_s30, %s3434_s30   ;;  %s2431_s29 = sphi %s2534_s29, %s3433_s29   ;;  %s2427_s28 = sphi %s2532_s28, %s3432_s28   ;;  %s2423_s27 = sphi %s2530_s27, %s3423_s27   ;;  %s2419_s26 = sphi %s2528_s26, %s3422_s26  }
  0x17   : > { %3350 = sst [smem:[#allocation22_spill]] %s2423_s27  ;;  %p1670_p0 = scmp.ge.s32.totalorder %s2471_s15, 1 }
  0x18   : > { %3351 = sst [smem:[#allocation23_spill]] %s2427_s28  ;;  %p3312_p1 = scmp.eq.s32.totalorder %s2599_s16, 0 }
  0x19   : > { %3352 = sst [smem:[#allocation24_spill]] %s2435_s30  ;;  %p259_p3 = scmp.lt.s32.totalorder %s2471_s15, 5 }
  0x1a   : > { %3353 = sst [smem:[#allocation25_spill]] %s2455_s11  ;;  %s2473_s18 = smov [#allocation9]  }
  0x1b   : > { %3354 = sst [smem:[#allocation26_spill]] %s2459_s12  ;;  %p2605_p4 = pnand %p1670_p0, %p259_p3 }
  0x1c   : > { %3355 = sst [smem:[#allocation27_spill]] %s2463_s13  ;;  %s271_s19 = sshll.u32 %s2473_s18, 4  ;;  %s272_s19 = int_to_ptr.vmem [resolvable:$true] %s271_s19 }
  0x1d   : > { %3356 = sst [smem:[#allocation28_spill]] %s2467_s14  ;;  %p1906_p5 = pneg %p2605_p4 }
  0x1e   : > { %s3357_s17 = scalar_select %p2605_p4, 1, 0 }
  0x1f   : > { %p2613_p6 = pnand %p1906_p5, %p3312_p1  ;;  %s3360_s3 = sld [smem:[#allocation39_spill]] }
  0x20   : > { %3358 = sst [smem:[#allocation29_spill]] %s3357_s17 }
  0x21   : > { %s3359_s20 = scalar_select %p2613_p6, 1, 0 }
  0x22   : > { %p2625_p8 = pneg %p2613_p6 }
  0x25   : > { %s2135_s23 = scalar_lea.hbm %s3360_s3, 384 }
  0x26   : > { %p2136_p7 = scmp.ne.s32.totalorder %s3360_s3, %s2135_s23  ;;  %p2142_p11 = scmp.lt.u32.totalorder %s2135_s23, %s3360_s3 }
  0x28   : > { %p2138_p9 = pnand %p2625_p8, %p2136_p7 }
  0x2a   : > { %p2139_p10 = pneg %p2138_p9 }
  0x2c   : > { %p2144_p12 = pnand %p2142_p11, %p2139_p10 }
  0x2e   : > { %2147 = shalt.err (!%p2144_p12)
}
  0x2f   : > { %s2148_s21 = scalar_lea.vmem %s272_s19, 384  ;;  %p2156_p5 = scmp.lt.s32.totalorder %s272_s19, %s272_s19 }
  0x30   : > { %p2149_p13 = scmp.ne.s32.totalorder %s272_s19, %s2148_s21  ;;  %p2157_p2 = scmp.lt.s32.totalorder %s2148_s21, %s2148_s21 }
  0x32   : > { %p2151_p0 = pnand %p2149_p13, %p2625_p8  ;;  %p2158_p1 = por %p2157_p2, %p2156_p5 }
  0x34   : > { %p2152_p3 = pneg %p2151_p0 }
  0x36   : > { %p2159_p4 = pnand %p2158_p1, %p2152_p3 }
  0x38   : > { %2162 = shalt.err (!%p2159_p4)
}
  0x39   : > { %s3317_s22 = smov 64   ;;  %s3319_s7 = smov 4  }
  0x3a   : > { %1909 = dma.hbm_to_vmem [thread:$0]  (!%p2613_p6), %s3360_s3, 384, %s272_s19, [#allocation10], %s3317_s22, %s3317_s22, %s3319_s7  }
  0x3b   : > { %s39_s24 = sadd.s32 1, %s2463_s13  ;;  %s42_s25 = sadd.s32 1, %s2467_s14 }
  0x3c   : > { %p40_p1 = scmp.ge.s32.totalorder %s39_s24, 2  ;;  %p3333_p2 = scmp.eq.s32.totalorder %s2471_s15, 0 }
  0x3d   : > { %s1664_s21 = sshll.u32 %s2463_s13, 3  ;;  %s87_s11 = sadd.s32 1, %s2439_s6 }
  0x3e   : > { %s3442_s24 = smov (%p40_p1, %s39_s24), 0  ;;  %s3444_s25 = smov (!%p40_p1, %s42_s25), %s2467_s14 }
  0x3f   : > { %3362 = sst [smem:[#allocation30_spill]] %s3442_s24  ;;  %s47_s17 = ssub.s32 %s2463_s13, %s3442_s24 }
  0x40   : > { %s1665_s2 = sadd.s32 4294967295, %s1664_s21  ;;  %p44_p4 = scmp.ge.s32.totalorder %s3444_s25, 2 }
  0x41   : > { %p76_p7 = scmp.gt.s32.totalorder %s1665_s2, 0  ;;  %s1666_s19 = sshll.u32 %s3442_s24, 3 }
  0x42   : > { %p94_p9 = scmp.ne.s32.totalorder %s2439_s6, %s2435_s30  ;;  %s3446_s25 = smov (%p44_p4, %s3444_s25), 0 }
  0x43   : > { %3363 = sst [smem:[#allocation31_spill]] %s3446_s25  ;;  %s3448_s2 = smov (!%p76_p7, %s1665_s2), 0 }
  0x44   : > { %s2661_s12 = ssub.s32 %s2467_s14, %s3446_s25  ;;  %s1667_s23 = sadd.s32 4294967295, %s1666_s19 }
  0x45   : > { %3364 = sst [smem:[#allocation32_spill]] %s2661_s12  ;;  %s2664_s22 = sor.u32 %s47_s17, %s2661_s12 }
  0x46   : > { %p80_p10 = scmp.gt.s32.totalorder %s1667_s23, 0  ;;  %p2669_p12 = por %p94_p9, %p3333_p2 }
  0x47   : > { %p100_p13 = scmp.ne.s32.totalorder %s2435_s30, %s2431_s29  ;;  %s2675_s3 = sadd.s32 8, %s1664_s21 }
  0x48   : > { %s3450_s23 = smov (!%p80_p10, %s1667_s23), 0  ;;  %3366 = sst [smem:[#allocation33_spill]] %s2675_s3 }
  0x49   : > { %s83_s25 = ssub.s32 %s3448_s2, %s3450_s23  ;;  %p3367_p3 = scmp.eq.s32.totalorder %s2599_s16, 0 }
  0x4a   : > { %s84_s17 = sor.u32 %s83_s25, %s2661_s12  ;;  %s2685_s26 = sadd.s32 8, %s1666_s19 }
  0x4b   : > { %p2681_p5 = por %p100_p13, %p3367_p3  ;;  %p85_p1 = scmp.eq.s32.totalorder %s84_s17, 0 }
  0x4c   : > { %p3332_p7 = scmp.lt.s32.totalorder %s2471_s15, 4  ;;  %s2693_s21 = sshll.u32 %s2467_s14, 5 }
  0x4d   : > { %s3368_s24 = scalar_select %p2681_p5, 1, 0 }
  0x4e   : > { %s2690_s29 = scalar_select %p85_p1, %s2439_s6, %s87_s11  }
  0x4f   : > { %3369 = sst [smem:[#allocation34_spill]] %s3368_s24  ;;  %s334_s23 = sand.u32 1, %s2471_s15  }
  0x50   : > { %s336_s25 = sand.u32 1, %s2439_s6   ;;  %s1683_s12 = sshll.u32 %s3448_s2, 1 }
  0x51   : > { %s1680_s30 = sshll.u32 %s336_s25, 3  ;;  %s348_s27 = sadd.s32 %s1683_s12, %s2693_s21 }
  0x52   : > { %s1685_s3 = sshll.u32 %s348_s27, 6  ;;  %s338_s24 = scalar_lea.vmem [#allocation6], %s1680_s30 }
  0x53   : > { %s351_s17 = sshll.u32 %s338_s24, 4  ;;  %s3370_s1 = sld [smem:[#allocation37_spill]]  ;;  %s2703_s17 = int_to_ptr.vmem [resolvable:$true] %s351_s17 }
  0x54   : > { %p2709_p9 = pnand %p3332_p7, %p2669_p12  ;;  %s2476_s2 = smov [#allocation11]  }
  0x55   : > { %s285_s27 = sshll.u32 %s2476_s2, 4  ;;  %s2715_s0 = scalar_lea.sflag [#allocation7], %s334_s23  ;;  %s2713_s27 = int_to_ptr.vmem [resolvable:$true] %s285_s27 }
  0x56   : > { %p2165_p13 = pneg %p2709_p9 }
  0x59   : > { %s2701_s19 = scalar_lea.hbm %s3370_s1, %s1685_s3  ;;  %s2168_s7 = scalar_lea.hbm %s3370_s1, 4096 }
  0x5a   : > { %s2163_s3 = scalar_lea.hbm %s2701_s19, 128  ;;  %p2169_p12 = scmp.lt.u32.totalorder %s2701_s19, %s3370_s1 }
  0x5b   : > { %p2164_p10 = scmp.ne.s32.totalorder %s2701_s19, %s2163_s3  ;;  %p2170_p4 = scmp.lt.u32.totalorder %s2168_s7, %s2163_s3 }
  0x5c   : > { %p2172_p7 = scmp.lt.u32.totalorder %s2163_s3, %s2701_s19 }
  0x5d   : > { %p2166_p3 = pnand %p2165_p13, %p2164_p10  ;;  %p2171_p0 = por %p2170_p4, %p2169_p12 }
  0x5f   : > { %p2167_p1 = pneg %p2166_p3  ;;  %p2173_p2 = por %p2172_p7, %p2171_p0 }
  0x61   : > { %p2174_p11 = pnand %p2173_p2, %p2167_p1 }
  0x63   : > { %2177 = shalt.err (!%p2174_p11)
}
  0x64   : > { %s2178_s23 = scalar_lea.vmem %s2703_s17, 128  ;;  %s2477_s25 = smov [#allocation6]  }
  0x65   : > { %p2179_p10 = scmp.ne.s32.totalorder %s2703_s17, %s2178_s23  ;;  %s2183_s2 = sshll.u32 %s2477_s25, 4  ;;  %s2184_s2 = int_to_ptr.vmem [resolvable:$false] %s2183_s2 }
  0x66   : > { %s2185_s28 = scalar_lea.vmem %s2184_s2, 256  ;;  %p2186_p6 = scmp.lt.s32.totalorder %s2703_s17, %s2184_s2 }
  0x67   : > { %p2181_p3 = pnand %p2179_p10, %p2165_p13  ;;  %p2187_p4 = scmp.lt.s32.totalorder %s2185_s28, %s2178_s23 }
  0x69   : > { %p2182_p5 = pneg %p2181_p3  ;;  %p2188_p12 = por %p2187_p4, %p2186_p6 }
  0x6b   : > { %p2189_p0 = pnand %p2188_p12, %p2182_p5 }
  0x6d   : > { %2192 = shalt.err (!%p2189_p0)
}
  0x6e   : > { %s3372_s3 = smov 4   ;;  %s3373_s30 = smov 64  }
  0x6f   : > { %1922 = dma.hbm_to_vmem [thread:$0]  (!%p2709_p9), %s2701_s19, 128, %s2703_s17, %s2715_s0, %s3373_s30, %s3373_s30, %s3372_s3  }
  0x70   : > { %s3374_s4 = sld [smem:[#allocation40_spill]] }
  0x76   : > { %s2193_s12 = scalar_lea.hbm %s3374_s4, 16 }
  0x77   : > { %p2194_p6 = scmp.ne.s32.totalorder %s3374_s4, %s2193_s12  ;;  %p2200_p5 = scmp.lt.u32.totalorder %s2193_s12, %s3374_s4 }
  0x79   : > { %p2196_p2 = pnand %p2194_p6, %p2625_p8 }
  0x7b   : > { %p2197_p11 = pneg %p2196_p2 }
  0x7d   : > { %p2202_p7 = pnand %p2200_p5, %p2197_p11 }
  0x7f   : > { %2205 = shalt.err (!%p2202_p7)
}
  0x80   : > { %s2206_s17 = scalar_lea.vmem %s2713_s27, 16  ;;  %s2213_s19 = scalar_lea.vmem %s2713_s27, 32 }
  0x81   : > { %p2207_p9 = scmp.ne.s32.totalorder %s2713_s27, %s2206_s17  ;;  %p2214_p10 = scmp.lt.s32.totalorder %s2713_s27, %s2713_s27 }
  0x82   : > { %p2215_p3 = scmp.lt.s32.totalorder %s2213_s19, %s2206_s17 }
  0x83   : > { %p2209_p13 = pnand %p2207_p9, %p2625_p8 }
  0x84   : > { %p2216_p4 = por %p2215_p3, %p2214_p10 }
  0x85   : > { %p2210_p1 = pneg %p2209_p13 }
  0x87   : > { %p2217_p12 = pnand %p2216_p4, %p2210_p1 }
  0x89   : > { %2220 = shalt.err (!%p2217_p12)
}
  0x8a   : > { %p3375_p0 = scmp.ne.s32.totalorder %s3359_s20, 0  ;;  %s2478_s24 = smov [#allocation12]  }
  0x8b   : > { %s296_s12 = sshll.u32 %s2478_s24, 4  ;;  %s3376_s5 = sld [smem:[#allocation41_spill]]  ;;  %s297_s12 = int_to_ptr.vmem [resolvable:$true] %s296_s12 }
  0x8c   : > { %1912 = dma.hbm_to_vmem [thread:$0]  (!%p3375_p0), %s3374_s4, 16, %s2713_s27, [#allocation10]  }
  0x91   : > { %s2221_s11 = scalar_lea.hbm %s3376_s5, 16 }
  0x92   : > { %p2222_p6 = scmp.ne.s32.totalorder %s3376_s5, %s2221_s11  ;;  %p2228_p5 = scmp.lt.u32.totalorder %s2221_s11, %s3376_s5 }
  0x94   : > { %p2224_p2 = pnand %p2222_p6, %p2625_p8 }
  0x96   : > { %p2225_p11 = pneg %p2224_p2 }
  0x98   : > { %p2230_p7 = pnand %p2228_p5, %p2225_p11 }
  0x9a   : > { %2233 = shalt.err (!%p2230_p7)
}
  0x9b   : > { %s2234_s27 = scalar_lea.vmem %s297_s12, 16  ;;  %s2241_s28 = scalar_lea.vmem %s297_s12, 32 }
  0x9c   : > { %p2235_p9 = scmp.ne.s32.totalorder %s297_s12, %s2234_s27  ;;  %p2242_p10 = scmp.lt.s32.totalorder %s297_s12, %s297_s12 }
  0x9d   : > { %p2243_p3 = scmp.lt.s32.totalorder %s2241_s28, %s2234_s27 }
  0x9e   : > { %p2237_p13 = pnand %p2235_p9, %p2625_p8 }
  0x9f   : > { %p2244_p4 = por %p2243_p3, %p2242_p10 }
  0xa0   : > { %p2238_p1 = pneg %p2237_p13 }
  0xa2   : > { %p2245_p12 = pnand %p2244_p4, %p2238_p1 }
  0xa4   : > { %2248 = shalt.err (!%p2245_p12)
}
  0xa5   : > { %1915 = dma.hbm_to_vmem [thread:$0]  (!%p3375_p0), %s3376_s5, 16, %s297_s12, [#allocation13]  }
  0xa6   : > { %s1663_s1 = sadd.s32 4294967294, %s2471_s15   ;;  %s51_s20 = sadd.s32 1, %s2451_s10 }
  0xa7   : > { %p3377_p8 = scmp.eq.s32.totalorder %s2664_s22, 0  ;;  %p58_p6 = scmp.ne.s32.totalorder %s2451_s10, %s2447_s9 }
  0xa8   : > { %p64_p2 = scmp.ne.s32.totalorder %s2447_s9, %s2443_s8  ;;  %p252_p11 = scmp.eq.s32.totalorder %s1663_s1, 3 }
  0xa9   : > { %s2793_s18 = scalar_select %p3377_p8, %s2451_s10, %s51_s20  }
  0xaa   : > { %s310_s25 = sand.u32 1, %s2451_s10   ;;  %p3379_p5 = scmp.eq.s32.totalorder %s2471_s15, 0 }
  0xab   : > { %3378 = sst [smem:[#allocation35_spill]] %s2793_s18  ;;  %p3380_p9 = scmp.eq.s32.totalorder %s2599_s16, 0 }
  0xac   : > { %p60_p7 = por %p3379_p5, %p58_p6  ;;  %p3382_p1 = scmp.eq.s32.totalorder %s2599_s16, 3 }
  0xad   : > { %p2804_p13 = por %p3380_p9, %p64_p2  ;;  %p2814_p0 = por %p252_p11, %p64_p2 }
  0xae   : > { %p2810_p10 = por %p3382_p1, %p58_p6  ;;  %s1675_s11 = sshll.u32 %s310_s25, 6 }
  0xaf   : > { %s3384_s22 = scalar_select %p2814_p0, 1, 0 }
  0xb0   : > { %s3383_s12 = scalar_select %p2810_p10, 1, 0 }
  0xb1   : > { %s1748_s23 = sshll.u32 %s2463_s13, 4  ;;  %s314_s19 = scalar_lea.vmem [#allocation3], %s1675_s11 }
  0xb2   : > { %s321_s17 = sadd.s32 %s1748_s23, %s2693_s21  ;;  %s324_s27 = sshll.u32 %s314_s19, 4  ;;  %s2820_s27 = int_to_ptr.vmem [resolvable:$true] %s324_s27 }
  0xb3   : > { %s1679_s28 = sshll.u32 %s321_s17, 6  ;;  %s3385_s1 = sld [smem:[#allocation36_spill]] }
  0xb4   : > { %p3386_p3 = scmp.lt.s32.totalorder %s2471_s15, 4  ;;  %s2833_s11 = scalar_lea.sflag [#allocation4], %s310_s25 }
  0xb6   : > { %p2829_p4 = pnand %p3386_p3, %p60_p7 }
  0xb8   : > { %p2251_p8 = pneg %p2829_p4 }
  0xb9   : > { %s2825_s20 = scalar_lea.hbm %s3385_s1, %s1679_s28  ;;  %s2254_s28 = scalar_lea.hbm %s3385_s1, 4096 }
  0xba   : > { %s2249_s23 = scalar_lea.hbm %s2825_s20, 1024  ;;  %p2255_p11 = scmp.lt.u32.totalorder %s2825_s20, %s3385_s1 }
  0xbb   : > { %p2250_p12 = scmp.ne.s32.totalorder %s2825_s20, %s2249_s23  ;;  %p2256_p5 = scmp.lt.u32.totalorder %s2254_s28, %s2249_s23 }
  0xbc   : > { %p2258_p9 = scmp.lt.u32.totalorder %s2249_s23, %s2825_s20 }
  0xbd   : > { %p2252_p6 = pnand %p2251_p8, %p2250_p12  ;;  %p2257_p7 = por %p2256_p5, %p2255_p11 }
  0xbf   : > { %p2253_p2 = pneg %p2252_p6  ;;  %p2259_p1 = por %p2258_p9, %p2257_p7 }
  0xc1   : > { %p2260_p3 = pnand %p2259_p1, %p2253_p2 }
  0xc3   : > { %2263 = shalt.err (!%p2260_p3)
}
  0xc4   : > { %s2264_s25 = scalar_lea.vmem %s2820_s27, 1024  ;;  %s2479_s17 = smov [#allocation3]  }
  0xc5   : > { %p2265_p12 = scmp.ne.s32.totalorder %s2820_s27, %s2264_s25  ;;  %s2269_s19 = sshll.u32 %s2479_s17, 4  ;;  %s2270_s19 = int_to_ptr.vmem [resolvable:$false] %s2269_s19 }
  0xc6   : > { %s2271_s7 = scalar_lea.vmem %s2270_s19, 2048  ;;  %p2272_p10 = scmp.lt.s32.totalorder %s2820_s27, %s2270_s19 }
  0xc7   : > { %p2267_p6 = pnand %p2265_p12, %p2251_p8  ;;  %p2273_p11 = scmp.lt.s32.totalorder %s2271_s7, %s2264_s25 }
  0xc9   : > { %p2268_p0 = pneg %p2267_p6  ;;  %p2274_p5 = por %p2273_p11, %p2272_p10 }
  0xcb   : > { %p2275_p7 = pnand %p2274_p5, %p2268_p0 }
  0xcd   : > { %2278 = shalt.err (!%p2275_p7)
}
  0xce   : > { %s3388_s23 = sld [smem:[#allocation23_spill]]  ;;  %s3389_s28 = sld [smem:[#allocation33_spill]] }
  0xcf   : > { %s3390_s24 = sld [smem:[#allocation22_spill]]  ;;  %s3392_s25 = sld [smem:[#allocation32_spill]] }
  0xd0   : > { %s3391_s17 = sld [smem:[#allocation21_spill]]  ;;  %p3394_p0 = scmp.lt.s32.totalorder %s2685_s26, 15 }
  0xd1   : > { %1919 = dma.hbm_to_vmem [thread:$0]  (!%p2829_p4), %s2825_s20, 1024, %s2820_s27, %s2833_s11, %s3373_s30, %s3373_s30, %s3372_s3  }
  0xd2   : > { %s3454_s26 = smov (!%p3394_p0, %s2685_s26), 15  ;;  %p3395_p9 = scmp.eq.s32.totalorder %s2471_s15, 0 }
  0xd3   : > { %p3396_p12 = scmp.eq.s32.totalorder %s2599_s16, 0  ;;  %s3398_s18 = sld [smem:[#allocation38_spill]] }
  0xd4   : > { %s123_s4 = sadd.s32 1, %s3388_s23  ;;  %p3393_p10 = scmp.lt.s32.totalorder %s3389_s28, 15 }
  0xd5   : > { %p130_p8 = scmp.ne.s32.totalorder %s3388_s23, %s3390_s24  ;;  %s363_s7 = sand.u32 1, %s3388_s23  }
  0xd6   : > { %s3452_s28 = smov (!%p3393_p10, %s3389_s28), 15  ;;  %p136_p2 = scmp.ne.s32.totalorder %s3390_s24, %s3391_s17 }
  0xd7   : > { %s119_s19 = ssub.s32 %s3452_s28, %s3454_s26  ;;  %p132_p1 = por %p130_p8, %p3395_p9 }
  0xd8   : > { %s120_s1 = sor.u32 %s119_s19, %s3392_s25  ;;  %p2881_p6 = por %p136_p2, %p3396_p12 }
  0xd9   : > { %p121_p3 = scmp.eq.s32.totalorder %s120_s1, 0  ;;  %s1686_s27 = sshll.u32 %s363_s7, 3 }
  0xda   : > { %s3397_s5 = scalar_select %p2881_p6, 1, 0 }
  0xdb   : > { %s1688_s20 = sshll.u32 %s3452_s28, 1  ;;  %s3456_s23 = smov (!%p121_p3, %s3388_s23), %s123_s4 }
  0xdc   : > { %s375_s11 = sadd.s32 %s1688_s20, %s2693_s21  ;;  %s365_s13 = scalar_lea.vmem [#allocation8], %s1686_s27 }
  0xdd   : > { %s1690_s14 = sshll.u32 %s375_s11, 6  ;;  %s378_s24 = sshll.u32 %s365_s13, 4  ;;  %s2894_s24 = int_to_ptr.vmem [resolvable:$true] %s378_s24 }
  0xde   : > { %s2892_s25 = scalar_lea.hbm %s3398_s18, %s1690_s14  ;;  %p3399_p4 = scmp.lt.s32.totalorder %s2471_s15, 4 }
  0xdf   : > { %s2279_s21 = scalar_lea.hbm %s2892_s25, 128  ;;  %s2284_s28 = scalar_lea.hbm %s3398_s18, 4096 }
  0xe0   : > { %p2898_p11 = pnand %p3399_p4, %p132_p1  ;;  %p2280_p5 = scmp.ne.s32.totalorder %s2892_s25, %s2279_s21 }
  0xe1   : > { %p2285_p8 = scmp.lt.u32.totalorder %s2892_s25, %s3398_s18  ;;  %p2286_p2 = scmp.lt.u32.totalorder %s2284_s28, %s2279_s21 }
  0xe2   : > { %p2281_p7 = pneg %p2898_p11  ;;  %p2288_p1 = scmp.lt.u32.totalorder %s2279_s21, %s2892_s25 }
  0xe3   : > { %p2287_p9 = por %p2286_p2, %p2285_p8 }
  0xe4   : > { %p2282_p10 = pnand %p2281_p7, %p2280_p5 }
  0xe5   : > { %p2289_p3 = por %p2288_p1, %p2287_p9 }
  0xe6   : > { %p2283_p0 = pneg %p2282_p10 }
  0xe8   : > { %p2290_p12 = pnand %p2289_p3, %p2283_p0 }
  0xea   : > { %2293 = shalt.err (!%p2290_p12)
}
  0xeb   : > { %s2294_s7 = scalar_lea.vmem %s2894_s24, 128  ;;  %s2480_s27 = smov [#allocation8]  }
  0xec   : > { %p2295_p4 = scmp.ne.s32.totalorder %s2894_s24, %s2294_s7  ;;  %s2299_s20 = sshll.u32 %s2480_s27, 4  ;;  %s2300_s20 = int_to_ptr.vmem [resolvable:$false] %s2299_s20 }
  0xed   : > { %s2301_s11 = scalar_lea.vmem %s2300_s20, 256  ;;  %p2302_p6 = scmp.lt.s32.totalorder %s2894_s24, %s2300_s20 }
  0xee   : > { %p2297_p5 = pnand %p2295_p4, %p2281_p7  ;;  %p2303_p8 = scmp.lt.s32.totalorder %s2301_s11, %s2294_s7 }
  0xf0   : > { %p2298_p10 = pneg %p2297_p5  ;;  %p2304_p2 = por %p2303_p8, %p2302_p6 }
  0xf2   : > { %p2305_p9 = pnand %p2304_p2, %p2298_p10 }
  0xf4   : > { %2308 = shalt.err (!%p2305_p9)
}
  0xf5   : > { %1925 = dma.hbm_to_vmem [thread:$0]  (!%p2898_p11), %s2892_s25, 128, %s2894_s24, %s2715_s0, %s3373_s30, %s3373_s30, %s3372_s3  }
  0xf6   : > { %s3401_s17 = sld [smem:[#allocation29_spill]] }
  0xfc   : > { %p3402_p7 = scmp.ne.s32.totalorder %s3401_s17, 0 }
  0xfd   : > { %s2934_s26 = sand.u32 (!%p3402_p7), 1, %s2447_s9  }
  0xfe   : > { %390 = sbr.rel (%p3402_p7) target bundleno = 897 (0x381), region = 48  ;;  %s1692_s21 = sshll.u32 (!%p3402_p7), %s2934_s26, 6 }
  0xff   : > { %s393_s13 = scalar_lea.sflag (!%p3402_p7), [#allocation4], %s2934_s26  ;;  %s2938_s14 = scalar_lea.vmem (!%p3402_p7), [#allocation3], %s1692_s21 }
 0x105   : > { %2394 = dma.done.wait (%p2804_p13), %s393_s13, 1024  }
 0x106   : > { %2396 = vsyncadd (%p2804_p13), %s393_s13, 4294966272  ;;  %s3403_s0 = sld [smem:[#allocation24_spill]]  ;;  %s3404_s3 = sld [smem:[#allocation34_spill]] }
 0x107   : > { %s401_s30 = sand.u32 1, %s2599_s16  }
 0x108   : > { %s402_s1 = scalar_lea.sflag [#allocation7], %s401_s30 }
 0x10c   : > { %s403_s24 = sand.u32 1, %s3403_s0   ;;  %p3405_p6 = scmp.ne.s32.totalorder %s3404_s3, 0 }
 0x10d   : > { %s2946_s25 = sshll.u32 %s403_s24, 3 }
 0x10e   : > { %s405_s28 = scalar_lea.vmem [#allocation6], %s2946_s25 }
 0x10f   : > { %2398 = dma.done.wait (%p3405_p6), %s402_s1, 128  }
 0x110   : > { %2400 = vsyncadd (%p3405_p6), %s402_s1, 4294967168  ;;  %s3406_s4 = sld [smem:[#allocation22_spill]]  ;;  %p3407_p13 = scmp.ne.s32.totalorder %s3397_s5, 0 }
 0x116   : > { %s412_s19 = sand.u32 1, %s3406_s4  }
 0x117   : > { %s2954_s2 = sshll.u32 %s412_s19, 3 }
 0x118   : > { %s414_s7 = scalar_lea.vmem [#allocation8], %s2954_s2 }
 0x119   : > { %2402 = dma.done.wait (%p3407_p13), %s402_s1, 128  }
 0x11a   : > { %2404 = vsyncadd (%p3407_p13), %s402_s1, 4294967168  ;;  %p3408_p11 = scmp.eq.s32.totalorder %s2599_s16, 0 }
 0x11c   : > { %2406 = dma.done.wait (%p3408_p11), [#allocation10], 400   ;;  %p3409_p0 = pmov %p3408_p11 }
 0x11e   : > { %2408 = vsyncadd (%p3409_p0), [#allocation10], 4294966896  ;;  %p3410_p1 = pmov %p3409_p0 }
 0x11f   : > { %p3411_p3 = pmov %p3409_p0 }
 0x120   : > { %2410 = dma.done.wait (%p3410_p1), [#allocation13], 16  }
 0x121   : > { %2412 = vsyncadd (%p3411_p3), [#allocation13], 4294967280  ;;  %s3412_s27 = sld [smem:[#allocation25_spill]]  ;;  %v2970_v1 = vld [vmem:[%s2938_s14 + $0x8] sm:$0xff]   ;;  %v2973_v2 = vld [vmem:[%s2938_s14] sm:$0xff]   ;;  %s2481_s5 = smov 8  }
 0x122   : > { %575 = vrot.lane.b32.xlu1 %v2970_v1, %s2481_s5  ;;  %v2978_v3 = vld [vmem:[%s2938_s14 + $0x10] sm:$0xff]   ;;  %s2482_s20 = smov 4   ;;  %v2985_v4 = vld [vmem:[%s2938_s14 + $0x18] sm:$0xff]   ;;  %v2993_v5 = vld [vmem:[%s2938_s14 + $0x20] sm:$0xff]   ;;  %vm665_vm0 = vcmask 1045504   ;;  %vm591_vm3 = vcmask 31744  }
 0x123   : > { %554 = vrot.lane.b32.xlu0 %v2973_v2, %s2482_s20  ;;  %v2068_v6 = vld [vmem:[#allocation9 + $0x8] sm:$0x3f]   ;;  %v2069_v7 = vld [vmem:[#allocation9] sm:$0x3f]   ;;  %v2070_v9 = vld [vmem:[#allocation9 + $0x10] sm:$0x3f]  }
 0x124   : > { %1882 = vmatprep.subr.msk.bf16.mxu1 %vm665_vm0, %v2068_v6  ;;  %v667_v8 = vsel %vm665_vm0, %v2068_v6, 0  ;;  %v3002_v10 = vld [vmem:[%s2938_s14 + $0x28] sm:$0xff]   ;;  %v881_v11 = vsel %vm665_vm0, %v2069_v7, 0  ;;  %1883 = vmatprep.subr.msk.bf16.mxu0 %vm665_vm0, %v2069_v7  ;;  %v3009_v12 = vsel %vm665_vm0, %v2070_v9, 0  ;;  %v3016_v14 = vld [vmem:[%s2938_s14 + $0x30] sm:$0xff]   ;;  %v2067_v17 = vld [vmem:[%s2938_s14 + $0x38] sm:$0xff]  }
 0x125   : > { %1779 = vmatpush3.bf16.msra.mxu1 %v667_v8  ;;  %1797 = vmatpush3.bf16.msra.mxu0 %v881_v11  ;;  %v495_v15 = vld [vmem:[%s414_s7] sm:$0xf]  ;;  %v496_v16 = vld [vmem:[%s414_s7 + $0x4] sm:$0xf]  ;;  %v493_v22 = vld [vmem:[%s405_s28] sm:$0xf] }
 0x126   : > { %577 = vrot.lane.b32.xlu1 %v2978_v3, %s2481_s5  ;;  %1884 = vmatprep.subr.msk.bf16.mxu1 %vm665_vm0, %v2069_v7  ;;  %v494_v23 = vld [vmem:[%s405_s28 + $0x4] sm:$0xf]  ;;  %vm616_vm4 = vcmask 64512   ;;  %vm648_vm5 = vcmask 97280   ;;  %vm838_vm6 = vcmask 1040384   ;;  %vm1020_vm9 = vcmask 1047552  }
 0x127   : > { %556 = vrot.lane.b32.xlu0 %v2970_v1, %s2482_s20  ;;  %p503_p12 = scmp.eq.s32.totalorder %s3412_s27, 1  ;;  %1885 = vmatprep.subr.msk.bf16.mxu0 %vm665_vm0, %v2070_v9  ;;  %p497_p4 = scmp.eq.s32.totalorder %s3412_s27, 0  ;;  %vm839_vm7 = vsmask.f32 256  ;;  %vm1021_vm10 = vsmask.f32 7424 }
 0x128   : > { %vm3045_vm8 = vmand %vm838_vm6, %vm839_vm7  ;;  %vm1218_vm12 = vcmask 261120   ;;  %vm1400_vm13 = vcmask 130112   ;;  %s3417_s17 = sld [smem:[#allocation26_spill]]  ;;  %vm1465_vm14 = vcmask 1041409   ;;  %vm1467_vm15 = vcmask 1042434   ;;  %s1698_s21 = sshll.u32 %s2934_s26, 3 }
 0x129   : > { %s504_s16 = scalar_select %p503_p12, 1, 0  ;;  %vm3078_vm11 = vmand %vm1020_vm9, %vm1021_vm10  ;;  %vm1469_vm0 = vcmask 1043459  }
 0x12a   : > { %560 = vrot.lane.b32.xlu1 %v2985_v4, %s2482_s20  ;;  %s498_s11 = scalar_select %p497_p4, 1, 0 }
 0x12b   : > { %558 = vrot.lane.b32.xlu0 %v2978_v3, %s2482_s20  ;;  %v505_v13 = vstv %s504_s16  ;;  %s466_s3 = scalar_lea.vmem [#allocation14], %s1698_s21  ;;  %s3418_s1 = sld [smem:[#allocation42_spill]] }
 0x12c   : > { %vm506_vm1 = vcmp.eq.s32.totalorder %v505_v13, 1  ;;  %v499_v21 = vstv %s498_s11  ;;  %s1498_s30 = sshll.u32 %s466_s3, 4  ;;  %s1483_s4 = scalar_lea.sflag [#allocation5], %s2934_s26  ;;  %s3227_s30 = int_to_ptr.vmem [resolvable:$true] %s1498_s30 }
 0x12d   : > { %v507_v18 = vsel %vm506_vm1, 0, %v495_v15  ;;  %v508_v19 = vsel %vm506_vm1, 0, %v496_v16  ;;  %vm500_vm2 = vcmp.eq.s32.totalorder %v499_v21, 1  ;;  %vm1471_vm1 = vcmask 1044484   ;;  %s2309_s19 = scalar_lea.vmem %s3227_s30, 128  ;;  %p3419_p10 = scmp.ne.s32.totalorder %s3383_s12, 0 }
 0x12e   : > { %581 = vrot.lane.b32.xlu1 %v2993_v5, %s2481_s5  ;;  %v1708_v20 = vcombine.low %v507_v18, %v508_v19  ;;  %v501_v24 = vsel %vm500_vm2, 0, %v493_v22  ;;  %v502_v25 = vsel %vm500_vm2, 0, %v494_v23  ;;  %s1740_s13 = sshll.u32 %s3417_s17, 1  ;;  %vm1473_vm2 = vcmask 1045509   ;;  %p2310_p5 = scmp.ne.s32.totalorder %s3227_s30, %s2309_s19 }
 0x12f   : > { %579 = vrot.lane.b32.xlu0 %v2985_v4, %s2481_s5  ;;  %v1699_v26 = vcombine.low %v501_v24, %v502_v25  ;;  %s1494_s14 = sadd.s32 %s3412_s27, %s1740_s13  ;;  %s2484_s2 = smov [#allocation14]  }
 0x130   : > { %s1741_s0 = sshll.u32 %s1494_s14, 7  ;;  %p2311_p8 = pnand %p2310_p5, %p3419_p10 }
 0x131   : > { %s3225_s28 = scalar_lea.hbm %s3418_s1, %s1741_s0  ;;  %s2313_s7 = sshll.u32 %s2484_s2, 4  ;;  %s2314_s7 = int_to_ptr.vmem [resolvable:$false] %s2313_s7 }
 0x132   : > { %564 = vrot.lane.b32.xlu1 %v3002_v10, %s2482_s20  ;;  %p2312_p2 = pneg %p2311_p8  ;;  %s2315_s27 = scalar_lea.vmem %s2314_s7, 256 }
 0x133   : > { %562 = vrot.lane.b32.xlu0 %v2993_v5, %s2482_s20  ;;  %p2316_p9 = scmp.lt.s32.totalorder %s3227_s30, %s2314_s7  ;;  %p2317_p7 = scmp.lt.s32.totalorder %s2315_s27, %s2309_s19 }
 0x135   : > { %p2318_p6 = por %p2317_p7, %p2316_p9 }
 0x136   : > { %585 = vrot.lane.b32.xlu1 %v3016_v14, %s2481_s5 }
 0x137   : > { %583 = vrot.lane.b32.xlu0 %v3002_v10, %s2481_s5  ;;  %p2319_p13 = pnand %p2318_p6, %p2312_p2 }
 0x13a   : > { %568 = vrot.lane.b32.xlu1 %v2067_v17, %s2482_s20 }
 0x13b   : > { %566 = vrot.lane.b32.xlu0 %v3016_v14, %s2482_s20 }
 0x13e   : > { %589 = vrot.lane.b32.xlu1 %v1708_v20, %s2481_s5 }
 0x13f   : > { %587 = vrot.lane.b32.xlu0 %v2067_v17, %s2481_s5 }
 0x194   : > { %v576_v27 = vpop.permute.xlu1 %575 }
 0x195   : > { %v555_v28 = vpop.permute.xlu0 %554 }
 0x196   : > { %v594_v29 = vsel %vm591_vm3, %v1699_v26, %v555_v28 }
 0x197   : > { %v618_v30 = vsel %vm616_vm4, %v594_v29, %v576_v27 }
 0x198   : > { %1780 = vmatprep.mubr.msk.bf16.mxu1 %vm648_vm5, %v618_v30  ;;  %v782_v31 = vshrl.u32 %v618_v30, 16  ;;  %v578_v32 = vpop.permute.xlu1 %577  ;;  %v785_v34 = vshll.u32 %v618_v30, 16 }
 0x199   : > { %v557_v33 = vpop.permute.xlu0 %556 }
 0x19a   : > { %v597_v35 = vsel %vm591_vm3, %v2973_v2, %v557_v33  ;;  %v784_v36 = vrot.slane %v782_v31, 7  ;;  %v996_v55 = vrot.slane %v785_v34, 1 }
 0x19b   : > { %v620_v37 = vsel %vm616_vm4, %v597_v35, %v578_v32 }
 0x19c   : > { %1781 = vmatmul.mubr.msk.bf16.vlgmr.msra.gmra.mrb[0].mxu1 %vm648_vm5, %v620_v37  ;;  %v788_v39 = vshrl.u32 %v620_v37, 16  ;;  %v561_v40 = vpop.permute.xlu1 %560  ;;  %v787_v41 = vor.u32 %v785_v34, %v784_v36  ;;  %v791_v43 = vshll.u32 %v620_v37, 16 }
 0x19d   : > { %v559_v42 = vpop.permute.xlu0 %558  ;;  %1833 = vmatpush3.bf16.msra.mxu1 %v881_v11  ;;  %v603_v46 = vsel %vm591_vm3, %v2978_v3, %v561_v40  ;;  %v997_v3 = vor.u32 %v996_v55, %v782_v31 }
 0x19e   : > { %v841_v44 = vsel %vm3045_vm8, 0, %v787_v41  ;;  %v790_v45 = vrot.slane %v788_v39, 7  ;;  %v600_v49 = vsel %vm591_vm3, %v2970_v1, %v559_v42 }
 0x19f   : > { %1798 = vmatprep.mubr.msk.bf16.mxu0 %vm648_vm5, %v841_v44  ;;  %v1023_v16 = vsel %vm3078_vm11, %v997_v3, 0 }
 0x1a0   : > { %v582_v47 = vpop.permute.xlu1 %581  ;;  %v793_v48 = vor.u32 %v791_v43, %v790_v45 }
 0x1a1   : > { %v3058_v50 = vsel %vm616_vm4, %v603_v46, %v582_v47  ;;  %v580_v51 = vpop.permute.xlu0 %579 }
 0x1a2   : > { %v800_v52 = vshrl.u32 %v3058_v50, 16  ;;  %v622_v53 = vsel %vm616_vm4, %v600_v49, %v580_v51  ;;  %v842_v54 = vsel %vm3045_vm8, 0, %v793_v48  ;;  %v803_v58 = vshll.u32 %v3058_v50, 16 }
 0x1a3   : > { %v794_v56 = vshrl.u32 %v622_v53, 16  ;;  %1784 = vmatprep.mubr.msk.bf16.mxu1 %vm648_vm5, %v622_v53  ;;  %1799 = vmatmul.mubr.msk.bf16.vlgmr.msra.gmra.mrb[0].mxu0 %vm648_vm5, %v842_v54  ;;  %v797_v61 = vshll.u32 %v622_v53, 16 }
 0x1a4   : > { %v802_v57 = vrot.slane %v800_v52, 7  ;;  %1815 = vmatpush3.bf16.msra.mxu0 %v3009_v12  ;;  %1785 = vmatmul.mubr.msk.bf16.gmra.mrb[4].mxu1 %vm648_vm5, %v3058_v50  ;;  %v565_v59 = vpop.permute.xlu1 %564  ;;  %v998_v12 = vrot.slane %v791_v43, 1  ;;  %v1002_v30 = vrot.slane %v803_v58, 1 }
 0x1a5   : > { %v796_v60 = vrot.slane %v794_v56, 7  ;;  %v563_v62 = vpop.permute.xlu0 %562  ;;  %v609_v63 = vsel %vm591_vm3, %v2993_v5, %v565_v59 }
 0x1a6   : > { %v805_v0 = vor.u32 %v803_v58, %v802_v57  ;;  %v606_v1 = vsel %vm591_vm3, %v2985_v4, %v563_v62  ;;  %v1000_v4 = vrot.slane %v797_v61, 1  ;;  %v999_v20 = vor.u32 %v998_v12, %v788_v39 }
 0x1a7   : > { %v799_v2 = vor.u32 %v797_v61, %v796_v60  ;;  %v1003_v40 = vor.u32 %v1002_v30, %v800_v52  ;;  %v2483_v62 = vmov 0  }
 0x1a8   : > { %v586_v6 = vpop.permute.xlu1 %585  ;;  %v844_v7 = vsel %vm3045_vm8, 0, %v805_v0  ;;  %v1001_v25 = vor.u32 %v1000_v4, %v794_v56  ;;  %v1024_v32 = vsel %vm3078_vm11, %v999_v20, 0  ;;  %2058 = vset.pattern.permute.xlu1 %v2483_v62  ;;  %2059 = vset.pattern.permute.xlu0 %v2483_v62 }
 0x1a9   : > { %v584_v9 = vpop.permute.xlu0 %583  ;;  %v628_v11 = vsel %vm616_vm4, %v609_v63, %v586_v6  ;;  %v843_v5 = vsel %vm3045_vm8, 0, %v799_v2  ;;  %v1026_v46 = vsel %vm3078_vm11, %v1003_v40, 0 }
 0x1aa   : > { %v626_v13 = vsel %vm616_vm4, %v606_v1, %v584_v9  ;;  %1802 = vmatprep.mubr.msk.bf16.mxu0 %vm648_vm5, %v843_v5  ;;  %v812_v23 = vshrl.u32 %v628_v11, 16  ;;  %v815_v36 = vshll.u32 %v628_v11, 16  ;;  %v3136_v9 = vld [vmem:[#allocation11] ss:$0 sm:$0xff] }
 0x1ab   : > { %v806_v15 = vshrl.u32 %v626_v13, 16  ;;  %1788 = vmatprep.mubr.msk.bf16.mxu1 %vm648_vm5, %v626_v13  ;;  %1803 = vmatmul.mubr.msk.bf16.gmra.mrb[4].mxu0 %vm648_vm5, %v844_v7  ;;  %v809_v21 = vshll.u32 %v626_v13, 16 }
 0x1ac   : > { %1789 = vmatmul.mubr.msk.bf16.gmra.mrb[8].mxu1 %vm648_vm5, %v628_v11  ;;  %1816 = vmatprep.mubr.msk.bf16.mxu0 %vm648_vm5, %v1023_v16  ;;  %v569_v17 = vpop.permute.xlu1 %568  ;;  %v814_v34 = vrot.slane %v812_v23, 7  ;;  %v1006_v45 = vrot.slane %v815_v36, 1 }
 0x1ad   : > { %v808_v18 = vrot.slane %v806_v15, 7  ;;  %v567_v19 = vpop.permute.xlu0 %566  ;;  %v615_v22 = vsel %vm591_vm3, %v3016_v14, %v569_v17  ;;  %v1004_v33 = vrot.slane %v809_v21, 1 }
 0x1ae   : > { %v612_v24 = vsel %vm591_vm3, %v3002_v10, %v567_v19  ;;  %v1025_v10 = vsel %vm3078_vm11, %v1001_v25, 0  ;;  %v817_v41 = vor.u32 %v815_v36, %v814_v34  ;;  %v1007_v53 = vor.u32 %v1006_v45, %v812_v23 }
 0x1af   : > { %v811_v27 = vor.u32 %v809_v21, %v808_v18  ;;  %v1005_v43 = vor.u32 %v1004_v33, %v806_v15  ;;  %v3142_v18 = vld [vmem:[#allocation12] ss:$0 sm:$0xff]  ;;  %vm1475_vm3 = vcmask 1046534  }
 0x1b0   : > { %v590_v26 = vpop.permute.xlu1 %589  ;;  %v846_v47 = vsel %vm3045_vm8, 0, %v817_v41  ;;  %v1028_v57 = vsel %vm3078_vm11, %v1007_v53, 0 }
 0x1b1   : > { %v588_v28 = vpop.permute.xlu0 %587  ;;  %v632_v29 = vsel %vm616_vm4, %v615_v22, %v590_v26  ;;  %v845_v14 = vsel %vm3045_vm8, 0, %v811_v27  ;;  %v1027_v51 = vsel %vm3078_vm11, %v1005_v43, 0 }
 0x1b2   : > { %v630_v31 = vsel %vm616_vm4, %v612_v24, %v588_v28  ;;  %v824_v42 = vshrl.u32 %v632_v29, 16  ;;  %v827_v52 = vshll.u32 %v632_v29, 16  ;;  %vm1477_vm4 = vcmask 1047559  }
 0x1b3   : > { %v818_v35 = vshrl.u32 %v630_v31, 16  ;;  %1792 = vmatprep.mubr.msk.bf16.mxu1 %vm648_vm5, %v630_v31  ;;  %1817 = vmatmul.mubr.msk.bf16.vlgmr.msra.gmra.mrb[0].mxu0 %vm648_vm5, %v1024_v32  ;;  %v821_v39 = vshll.u32 %v630_v31, 16 }
 0x1b4   : > { %1793 = vmatmul.mubr.msk.bf16.gmra.mrb[12].mxu1 %vm648_vm5, %v632_v29  ;;  %1820 = vmatprep.mubr.msk.bf16.mxu0 %vm648_vm5, %v1025_v10  ;;  %v826_v49 = vrot.slane %v824_v42, 7  ;;  %v1010_v56 = vrot.slane %v827_v52, 1 }
 0x1b5   : > { %v820_v37 = vrot.slane %v818_v35, 7  ;;  %1806 = vmatprep.mubr.msk.bf16.mxu1 %vm648_vm5, %v845_v14  ;;  %v1008_v48 = vrot.slane %v821_v39, 1 }
 0x1b6   : > { %v829_v54 = vor.u32 %v827_v52, %v826_v49  ;;  %v1011_v60 = vor.u32 %v1010_v56, %v824_v42 }
 0x1b7   : > { %v823_v44 = vor.u32 %v821_v39, %v820_v37  ;;  %v1009_v55 = vor.u32 %v1008_v48, %v818_v35 }
 0x1b8   : > { %v848_v58 = vsel %vm3045_vm8, 0, %v829_v54  ;;  %v1030_v61 = vsel %vm3078_vm11, %v1011_v60, 0 }
 0x1b9   : > { %v847_v50 = vsel %vm3045_vm8, 0, %v823_v44  ;;  %v1029_v59 = vsel %vm3078_vm11, %v1009_v55, 0 }
 0x1bb   : > { %1821 = vmatmul.mubr.msk.bf16.gmra.mrb[4].mxu0 %vm648_vm5, %v1026_v46 }
 0x1bc   : > { %1807 = vmatmul.mubr.msk.bf16.vlgmr.msra.gmra.mrb[8].mxu1 %vm648_vm5, %v846_v47  ;;  %1824 = vmatprep.mubr.msk.bf16.mxu0 %vm648_vm5, %v1027_v51 }
 0x1bd   : > { %1810 = vmatprep.mubr.msk.bf16.mxu1 %vm648_vm5, %v847_v50 }
 0x1c3   : > { %1825 = vmatmul.mubr.msk.bf16.gmra.mrb[8].mxu0 %vm648_vm5, %v1028_v57 }
 0x1c4   : > { %1811 = vmatmul.mubr.msk.bf16.gmra.mrb[12].mxu1 %vm648_vm5, %v848_v58  ;;  %1828 = vmatprep.mubr.msk.bf16.mxu0 %vm648_vm5, %v1029_v59 }
 0x1cb   : > { %1829 = vmatmul.mubr.msk.bf16.gmra.mrb[12].mxu0 %vm648_vm5, %v1030_v61  ;;  %vm1480_vm5 = vcmask 130048  }
 0x26f   : > { %v1782_v63 = vpop.f32.mrb[0].mxu1 }
 0x270   : > { %v703_v0 = vpop.f32.mrb[1].mxu1  ;;  %v768_v11 = vadd.f32 %v1782_v63, %v3136_v9 }
 0x271   : > { %v1783_v38 = vpop.f32.mrb[2].mxu1  ;;  %v766_v8 = vadd.f32 %v3136_v9, %v703_v0 }
 0x272   : > { %v706_v1 = vpop.f32.mrb[3].mxu1  ;;  %v769_v12 = vadd.f32 %v1783_v38, %v3136_v9 }
 0x273   : > { %v767_v15 = vadd.f32 %v3136_v9, %v706_v1 }
 0x277   : > { %v1786_v2 = vpop.f32.mrb[4].mxu1 }
 0x278   : > { %v719_v3 = vpop.f32.mrb[5].mxu1  ;;  %v772_v27 = vadd.f32 %v1786_v2, %v3136_v9 }
 0x279   : > { %v1787_v6 = vpop.f32.mrb[6].mxu1  ;;  %v770_v30 = vadd.f32 %v3136_v9, %v719_v3 }
 0x27a   : > { %v722_v7 = vpop.f32.mrb[7].mxu1  ;;  %v773_v33 = vadd.f32 %v1787_v6, %v3136_v9 }
 0x27b   : > { %v771_v14 = vadd.f32 %v3136_v9, %v722_v7 }
 0x286   : > { %v1818_v5 = vpop.f32.mrb[0].mxu0 }
 0x287   : > { %v1835_v13 = vadd.f32 %v1818_v5, %v768_v11  ;;  %v1100_v4 = vpop.f32.mrb[1].mxu0 }
 0x288   : > { %v1837_v16 = vadd.f32 %v1100_v4, %v766_v8  ;;  %v1819_v17 = vpop.f32.mrb[2].mxu0 }
 0x289   : > { %v1181_v19 = vmax.f32 %v1835_v13, 0.0  ;;  %v1839_v20 = vadd.f32 %v1819_v17, %v769_v12  ;;  %v1103_v21 = vpop.f32.mrb[3].mxu0 }
 0x28a   : > { %v1179_v22 = vmax.f32 %v1837_v16, 0.0  ;;  %v1841_v23 = vadd.f32 %v1103_v21, %v767_v15 }
 0x28b   : > { %v1204_v24 = vmul.f32 %v3142_v18, %v1181_v19  ;;  %v1182_v25 = vmax.f32 %v1839_v20, 0.0 }
 0x28c   : > { %v1180_v26 = vmax.f32 %v1841_v23, 0.0  ;;  %v1202_v29 = vmul.f32 %v3142_v18, %v1179_v22 }
 0x28d   : > { %v1225_v28 = vsel %vm1218_vm12, %v1204_v24, 0.0  ;;  %v1205_v41 = vmul.f32 %v3142_v18, %v1182_v25 }
 0x28e   : > { %1226 = vadd.xlane.f32.xlu0 %v1225_v28  ;;  %v1822_v31 = vpop.f32.mrb[4].mxu0  ;;  %v1203_v32 = vmul.f32 %v3142_v18, %v1180_v26  ;;  %v1219_v46 = vsel %vm1218_vm12, %v1202_v29, 0.0 }
 0x28f   : > { %v1843_v34 = vadd.f32 %v1822_v31, %v772_v27  ;;  %v1808_v35 = vpop.f32.mrb[8].mxu1  ;;  %v1116_v10 = vpop.f32.mrb[5].mxu0  ;;  %v1228_v52 = vsel %vm1218_vm12, %v1205_v41, 0.0 }
 0x290   : > { %v1845_v36 = vadd.f32 %v1116_v10, %v770_v30  ;;  %v949_v37 = vpop.f32.mrb[9].mxu1  ;;  %v1823_v39 = vpop.f32.mrb[6].mxu0  ;;  %v1222_v40 = vsel %vm1218_vm12, %v1203_v32, 0.0  ;;  %v1850_v54 = vadd.f32 %v1808_v35, %v3136_v9 }
 0x291   : > { %v1185_v42 = vmax.f32 %v1843_v34, 0.0  ;;  %v1847_v43 = vadd.f32 %v1823_v39, %v773_v33  ;;  %1223 = vadd.xlane.f32.xlu1 %v1222_v40  ;;  %v1809_v44 = vpop.f32.mrb[10].mxu1  ;;  %v1119_v45 = vpop.f32.mrb[7].mxu0  ;;  %v1852_v58 = vadd.f32 %v3136_v9, %v949_v37 }
 0x292   : > { %v1183_v47 = vmax.f32 %v1845_v36, 0.0  ;;  %v1849_v48 = vadd.f32 %v1119_v45, %v771_v14  ;;  %1220 = vadd.xlane.f32.xlu0 %v1219_v46  ;;  %v952_v49 = vpop.f32.mrb[11].mxu1  ;;  %v1854_v60 = vadd.f32 %v1809_v44, %v3136_v9 }
 0x293   : > { %v1186_v51 = vmax.f32 %v1847_v43, 0.0  ;;  %v1208_v50 = vmul.f32 %v3142_v18, %v1185_v42  ;;  %v1856_v0 = vadd.f32 %v3136_v9, %v952_v49 }
 0x294   : > { %v1206_v53 = vmul.f32 %v3142_v18, %v1183_v47  ;;  %v1184_v55 = vmax.f32 %v1849_v48, 0.0 }
 0x295   : > { %v1237_v56 = vsel %vm1218_vm12, %v1208_v50, 0.0  ;;  %v1209_v57 = vmul.f32 %v3142_v18, %v1186_v51  ;;  %v1738_v51 = vld [vmem:[#allocation2] ss:$0 sm:$0xff] }
 0x296   : > { %1229 = vadd.xlane.f32.xlu0 %v1228_v52  ;;  %1238 = vadd.xlane.f32.xlu1 %v1237_v56  ;;  %v1826_v59 = vpop.f32.mrb[8].mxu0  ;;  %v1231_v3 = vsel %vm1218_vm12, %v1206_v53, 0.0  ;;  %v1207_v12 = vmul.f32 %v3142_v18, %v1184_v55 }
 0x297   : > { %v1851_v61 = vadd.f32 %v1850_v54, %v1826_v59  ;;  %v1812_v62 = vpop.f32.mrb[12].mxu1  ;;  %v1132_v63 = vpop.f32.mrb[9].mxu0  ;;  %v1240_v5 = vsel %vm1218_vm12, %v1209_v57, 0.0 }
 0x298   : > { %v1853_v38 = vadd.f32 %v1852_v58, %v1132_v63  ;;  %v965_v1 = vpop.f32.mrb[13].mxu1  ;;  %v1827_v2 = vpop.f32.mrb[10].mxu0  ;;  %v1858_v19 = vadd.f32 %v1812_v62, %v3136_v9  ;;  %v1234_v22 = vsel %vm1218_vm12, %v1207_v12, 0.0 }
 0x299   : > { %v1189_v6 = vmax.f32 %v1851_v61, 0.0  ;;  %v1855_v7 = vadd.f32 %v1854_v60, %v1827_v2  ;;  %v1813_v11 = vpop.f32.mrb[14].mxu1  ;;  %v1135_v8 = vpop.f32.mrb[11].mxu0  ;;  %v1860_v25 = vadd.f32 %v3136_v9, %v965_v1 }
 0x29a   : > { %v1187_v13 = vmax.f32 %v1853_v38, 0.0  ;;  %v1857_v4 = vadd.f32 %v1856_v0, %v1135_v8  ;;  %1232 = vadd.xlane.f32.xlu1 %v1231_v3  ;;  %1241 = vadd.xlane.f32.xlu0 %v1240_v5  ;;  %v968_v15 = vpop.f32.mrb[15].mxu1  ;;  %v1862_v27 = vadd.f32 %v1813_v11, %v3136_v9 }
 0x29b   : > { %v1190_v16 = vmax.f32 %v1855_v7, 0.0  ;;  %v1212_v17 = vmul.f32 %v3142_v18, %v1189_v6  ;;  %v1864_v30 = vadd.f32 %v3136_v9, %v968_v15 }
 0x29c   : > { %v1210_v20 = vmul.f32 %v3142_v18, %v1187_v13  ;;  %v1188_v21 = vmax.f32 %v1857_v4, 0.0 }
 0x29d   : > { %v1249_v23 = vsel %vm1218_vm12, %v1212_v17, 0.0  ;;  %v1213_v24 = vmul.f32 %v3142_v18, %v1190_v16 }
 0x29e   : > { %1235 = vadd.xlane.f32.xlu0 %v1234_v22  ;;  %v1830_v26 = vpop.f32.mrb[12].mxu0  ;;  %1250 = vadd.xlane.f32.xlu1 %v1249_v23  ;;  %v1243_v33 = vsel %vm1218_vm12, %v1210_v20, 0.0  ;;  %v1211_v36 = vmul.f32 %v3142_v18, %v1188_v21 }
 0x29f   : > { %v1859_v28 = vadd.f32 %v1858_v19, %v1830_v26  ;;  %v1148_v29 = vpop.f32.mrb[13].mxu0  ;;  %v1252_v14 = vsel %vm1218_vm12, %v1213_v24, 0.0 }
 0x2a0   : > { %v1861_v31 = vadd.f32 %v1860_v25, %v1148_v29  ;;  %v1831_v32 = vpop.f32.mrb[14].mxu0  ;;  %v1246_v9 = vsel %vm1218_vm12, %v1211_v36, 0.0 }
 0x2a1   : > { %v1193_v34 = vmax.f32 %v1859_v28, 0.0  ;;  %v1863_v35 = vadd.f32 %v1862_v27, %v1831_v32  ;;  %v1151_v10 = vpop.f32.mrb[15].mxu0 }
 0x2a2   : > { %v1191_v37 = vmax.f32 %v1861_v31, 0.0  ;;  %v1865_v39 = vadd.f32 %v1864_v30, %v1151_v10  ;;  %1244 = vadd.xlane.f32.xlu1 %v1243_v33  ;;  %1253 = vadd.xlane.f32.xlu0 %v1252_v14 }
 0x2a3   : > { %v1216_v40 = vmul.f32 %v3142_v18, %v1193_v34  ;;  %v1194_v42 = vmax.f32 %v1863_v35, 0.0 }
 0x2a4   : > { %v1192_v41 = vmax.f32 %v1865_v39, 0.0  ;;  %v1214_v44 = vmul.f32 %v3142_v18, %v1191_v37 }
 0x2a5   : > { %v1261_v43 = vsel %vm1218_vm12, %v1216_v40, 0.0  ;;  %v1217_v48 = vmul.f32 %v3142_v18, %v1194_v42 }
 0x2a6   : > { %1247 = vadd.xlane.f32.xlu0 %v1246_v9  ;;  %1262 = vadd.xlane.f32.xlu1 %v1261_v43  ;;  %v1215_v45 = vmul.f32 %v3142_v18, %v1192_v41  ;;  %v1255_v47 = vsel %vm1218_vm12, %v1214_v44, 0.0 }
 0x2a7   : > { %v1264_v49 = vsel %vm1218_vm12, %v1217_v48, 0.0 }
 0x2a8   : > { %v1258_v46 = vsel %vm1218_vm12, %v1215_v45, 0.0 }
 0x2aa   : > { %1256 = vadd.xlane.f32.xlu1 %v1255_v47  ;;  %1259 = vadd.xlane.f32.xlu0 %v1258_v46 }
 0x2ae   : > { %1265 = vadd.xlane.f32.xlu0 %v1264_v49 }
 0x2bb   : > { %1274 = vperm.xlu1 %2058, %v1738_v51  }
 0x31b   : > { %v1227_v50 = vpop.xlane.xlu0 %1226 }
 0x31e   : > { %v1224_v52 = vpop.xlane.xlu1 %1223 }
 0x31f   : > { %v1221_v53 = vpop.xlane.xlu0 %1220 }
 0x323   : > { %v1239_v54 = vpop.xlane.xlu1 %1238  ;;  %v1230_v55 = vpop.xlane.xlu0 %1229 }
 0x327   : > { %v1233_v56 = vpop.xlane.xlu1 %1232  ;;  %v1242_v57 = vpop.xlane.xlu0 %1241 }
 0x32b   : > { %v1251_v58 = vpop.xlane.xlu1 %1250  ;;  %v1236_v59 = vpop.xlane.xlu0 %1235 }
 0x32f   : > { %v1245_v60 = vpop.xlane.xlu1 %1244  ;;  %v1254_v61 = vpop.xlane.xlu0 %1253 }
 0x333   : > { %v1263_v62 = vpop.xlane.xlu1 %1262  ;;  %v1248_v18 = vpop.xlane.xlu0 %1247 }
 0x337   : > { %v1257_v63 = vpop.xlane.xlu1 %1256  ;;  %v1260_v0 = vpop.xlane.xlu0 %1259 }
 0x33b   : > { %v1275_v38 = vpop.permute.xlu1 %1274  ;;  %v1266_v1 = vpop.xlane.xlu0 %1265 }
 0x33c   : > { %v1292_v2 = vadd.f32 %v1275_v38, %v1266_v1  ;;  %v1277_v3 = vadd.f32 %v1275_v38, %v1221_v53  ;;  %v1278_v6 = vadd.f32 %v1275_v38, %v1224_v52  ;;  %v1279_v7 = vadd.f32 %v1275_v38, %v1227_v50 }
 0x33d   : > { %v1280_v11 = vadd.f32 %v1275_v38, %v1230_v55  ;;  %v1281_v5 = vadd.f32 %v1275_v38, %v1233_v56  ;;  %v1282_v12 = vadd.f32 %v1275_v38, %v1236_v59  ;;  %v1283_v4 = vadd.f32 %v1275_v38, %v1239_v54 }
 0x33e   : > { %v1308_v8 = vsub.f32 0.0, %v1292_v2  ;;  %v1293_v15 = vsub.f32 0.0, %v1277_v3  ;;  %v1294_v16 = vsub.f32 0.0, %v1278_v6  ;;  %v1284_v17 = vadd.f32 %v1275_v38, %v1242_v57 }
 0x33f   : > { %v1295_v19 = vsub.f32 0.0, %v1279_v7  ;;  %v1296_v20 = vsub.f32 0.0, %v1280_v11  ;;  %v1285_v21 = vadd.f32 %v1275_v38, %v1245_v60  ;;  %v1297_v22 = vsub.f32 0.0, %v1281_v5 }
 0x340   : > { %v1339_v13 = vmul.f32 1.442695, %v1308_v8  ;;  %v1298_v23 = vsub.f32 0.0, %v1282_v12  ;;  %v1286_v24 = vadd.f32 %v1275_v38, %v1248_v18  ;;  %v1299_v25 = vsub.f32 0.0, %v1283_v4 }
 0x341   : > { %v1309_v26 = vmul.f32 1.442695, %v1293_v15  ;;  %v1311_v27 = vmul.f32 1.442695, %v1294_v16  ;;  %v1287_v28 = vadd.f32 %v1275_v38, %v1251_v58  ;;  %v1300_v29 = vsub.f32 0.0, %v1284_v17 }
 0x342   : > { %2071 = vpow2.f32 %v1339_v13  ;;  %v1313_v30 = vmul.f32 1.442695, %v1295_v19  ;;  %v1315_v31 = vmul.f32 1.442695, %v1296_v20  ;;  %v1288_v32 = vadd.f32 %v1275_v38, %v1254_v61 }
 0x343   : > { %v1301_v33 = vsub.f32 0.0, %v1285_v21  ;;  %2073 = vpow2.f32 %v1309_v26  ;;  %v1317_v34 = vmul.f32 1.442695, %v1297_v22  ;;  %v1289_v35 = vadd.f32 %v1275_v38, %v1257_v63 }
 0x344   : > { %2075 = vpow2.f32 %v1311_v27  ;;  %v1319_v10 = vmul.f32 1.442695, %v1298_v23  ;;  %v1290_v14 = vadd.f32 %v1275_v38, %v1260_v0  ;;  %v1302_v36 = vsub.f32 0.0, %v1286_v24 }
 0x345   : > { %2077 = vpow2.f32 %v1313_v30  ;;  %v1321_v37 = vmul.f32 1.442695, %v1299_v25  ;;  %v1291_v39 = vadd.f32 %v1275_v38, %v1263_v62  ;;  %v1303_v40 = vsub.f32 0.0, %v1287_v28 }
 0x346   : > { %2079 = vpow2.f32 %v1315_v31  ;;  %v1323_v41 = vmul.f32 1.442695, %v1300_v29  ;;  %v1304_v42 = vsub.f32 0.0, %v1288_v32  ;;  %v1325_v9 = vmul.f32 1.442695, %v1301_v33 }
 0x347   : > { %2081 = vpow2.f32 %v1317_v34  ;;  %v1305_v43 = vsub.f32 0.0, %v1289_v35  ;;  %v1306_v45 = vsub.f32 0.0, %v1290_v14  ;;  %v1327_v46 = vmul.f32 1.442695, %v1302_v36 }
 0x348   : > { %2083 = vpow2.f32 %v1319_v10  ;;  %v1307_v48 = vsub.f32 0.0, %v1291_v39  ;;  %v1329_v49 = vmul.f32 1.442695, %v1303_v40  ;;  %v1331_v51 = vmul.f32 1.442695, %v1304_v42 }
 0x349   : > { %2085 = vpow2.f32 %v1321_v37  ;;  %v1333_v50 = vmul.f32 1.442695, %v1305_v43  ;;  %v1335_v53 = vmul.f32 1.442695, %v1306_v45  ;;  %v1389_v57 = vlaneseq }
 0x34a   : > { %2087 = vpow2.f32 %v1323_v41  ;;  %v1337_v55 = vmul.f32 1.442695, %v1307_v48 }
 0x34b   : > { %2089 = vpow2.f32 %v1325_v9  ;;  %v1390_v38 = vand.u32 127, %v1389_v57  ;;  %v1392_v8 = vshrl.u32 %v1389_v57, 7 }
 0x34c   : > { %v2072_v44 = vpop.eup %2071 }
 0x34d   : > { %v1356_v47 = vadd.f32 1.0, %v2072_v44  ;;  %v2074_v52 = vpop.eup %2073  ;;  %v1395_v13 = vadd.s32 4294967288, %v1390_v38  ;;  %v3190_v22 = vsub.s32 %v1390_v38, %v1392_v8 }
 0x34e   : > { %v2076_v54 = vpop.eup %2075  ;;  %v1341_v58 = vadd.f32 1.0, %v2074_v52 }
 0x34f   : > { %2091 = vrcp.f32 %v1356_v47  ;;  %v2078_v56 = vpop.eup %2077  ;;  %v1342_v60 = vadd.f32 1.0, %v2076_v54  ;;  %v3192_v24 = vsub.s32 %v1395_v13, %v1392_v8 }
 0x350   : > { %2093 = vpow2.f32 %v1327_v46  ;;  %v2080_v59 = vpop.eup %2079  ;;  %v1343_v62 = vadd.f32 1.0, %v2078_v56 }
 0x351   : > { %2095 = vpow2.f32 %v1329_v49  ;;  %v2082_v61 = vpop.eup %2081  ;;  %v1344_v63 = vadd.f32 1.0, %v2080_v59 }
 0x352   : > { %2097 = vpow2.f32 %v1331_v51  ;;  %v2084_v18 = vpop.eup %2083  ;;  %v1345_v1 = vadd.f32 1.0, %v2082_v61 }
 0x353   : > { %2099 = vpow2.f32 %v1333_v50  ;;  %v2086_v0 = vpop.eup %2085  ;;  %v1346_v3 = vadd.f32 1.0, %v2084_v18 }
 0x354   : > { %2101 = vpow2.f32 %v1335_v53  ;;  %v2088_v2 = vpop.eup %2087  ;;  %v1347_v7 = vadd.f32 1.0, %v2086_v0 }
 0x355   : > { %2103 = vpow2.f32 %v1337_v55  ;;  %v2090_v6 = vpop.eup %2089  ;;  %v1348_v5 = vadd.f32 1.0, %v2088_v2 }
 0x356   : > { %2105 = vrcp.f32 %v1341_v58  ;;  %v1349_v4 = vadd.f32 1.0, %v2090_v6 }
 0x357   : > { %2107 = vrcp.f32 %v1342_v60 }
 0x358   : > { %2109 = vrcp.f32 %v1343_v62 }
 0x359   : > { %v3188_v11 = vpop.eup %2091  ;;  %2111 = vrcp.f32 %v1344_v63 }
 0x35a   : > { %v2094_v12 = vpop.eup %2093  ;;  %2113 = vrcp.f32 %v1345_v1  ;;  %v1463_v61 = vrot.slane %v3188_v11, %v3192_v24 }
 0x35b   : > { %v2096_v15 = vpop.eup %2095  ;;  %v1350_v16 = vadd.f32 1.0, %v2094_v12  ;;  %2115 = vrcp.f32 %v1346_v3 }
 0x35c   : > { %v2098_v17 = vpop.eup %2097  ;;  %v1351_v19 = vadd.f32 1.0, %v2096_v15  ;;  %2117 = vrcp.f32 %v1347_v7 }
 0x35d   : > { %v2100_v20 = vpop.eup %2099  ;;  %v1352_v21 = vadd.f32 1.0, %v2098_v17  ;;  %2119 = vrcp.f32 %v1348_v5 }
 0x35e   : > { %v2102_v23 = vpop.eup %2101  ;;  %v1353_v25 = vadd.f32 1.0, %v2100_v20  ;;  %2121 = vrcp.f32 %v1349_v4 }
 0x35f   : > { %v2104_v26 = vpop.eup %2103  ;;  %v1354_v27 = vadd.f32 1.0, %v2102_v23  ;;  %2123 = vrcp.f32 %v1350_v16 }
 0x360   : > { %v2106_v28 = vpop.eup %2105  ;;  %v1355_v29 = vadd.f32 1.0, %v2104_v26  ;;  %2125 = vrcp.f32 %v1351_v19 }
 0x361   : > { %v2108_v30 = vpop.eup %2107  ;;  %2127 = vrcp.f32 %v1352_v21  ;;  %v1394_v31 = vrot.slane %v2106_v28, %v3190_v22 }
 0x362   : > { %v2110_v32 = vpop.eup %2109  ;;  %2129 = vrcp.f32 %v1353_v25  ;;  %v1399_v33 = vrot.slane %v2108_v30, %v3192_v24 }
 0x363   : > { %v2112_v34 = vpop.eup %2111  ;;  %2131 = vrcp.f32 %v1354_v27  ;;  %v1405_v35 = vrot.slane %v2110_v32, %v3190_v22 }
 0x364   : > { %v2114_v10 = vpop.eup %2113  ;;  %2133 = vrcp.f32 %v1355_v29  ;;  %v1401_v14 = vsel %vm1400_vm13, %v1399_v33, %v1394_v31  ;;  %v1409_v36 = vrot.slane %v2112_v34, %v3192_v24 }
 0x365   : > { %v2116_v37 = vpop.eup %2115  ;;  %v1414_v39 = vrot.slane %v2114_v10, %v3190_v22 }
 0x366   : > { %v2118_v40 = vpop.eup %2117  ;;  %v1410_v41 = vsel %vm1400_vm13, %v1409_v36, %v1405_v35  ;;  %v1418_v42 = vrot.slane %v2116_v37, %v3192_v24 }
 0x367   : > { %v2120_v9 = vpop.eup %2119  ;;  %v1423_v43 = vrot.slane %v2118_v40, %v3190_v22  ;;  %v1466_v44 = vsel %vm1465_vm14, %v1410_v41, %v1401_v14 }
 0x368   : > { %v2122_v45 = vpop.eup %2121  ;;  %v1419_v46 = vsel %vm1400_vm13, %v1418_v42, %v1414_v39  ;;  %v1427_v47 = vrot.slane %v2120_v9, %v3192_v24 }
 0x369   : > { %v2124_v48 = vpop.eup %2123  ;;  %v1432_v49 = vrot.slane %v2122_v45, %v3190_v22  ;;  %v1468_v51 = vsel %vm1467_vm15, %v1419_v46, %v1466_v44 }
 0x36a   : > { %v2126_v50 = vpop.eup %2125  ;;  %v1428_v52 = vsel %vm1400_vm13, %v1427_v47, %v1423_v43  ;;  %v1436_v53 = vrot.slane %v2124_v48, %v3192_v24 }
 0x36b   : > { %v2128_v54 = vpop.eup %2127  ;;  %v1441_v55 = vrot.slane %v2126_v50, %v3190_v22  ;;  %v1470_v56 = vsel %vm1469_vm0, %v1428_v52, %v1468_v51 }
 0x36c   : > { %v2130_v57 = vpop.eup %2129  ;;  %v1437_v58 = vsel %vm1400_vm13, %v1436_v53, %v1432_v49  ;;  %v1445_v59 = vrot.slane %v2128_v54, %v3192_v24 }
 0x36d   : > { %v2132_v60 = vpop.eup %2131  ;;  %v1450_v62 = vrot.slane %v2130_v57, %v3190_v22  ;;  %v1472_v18 = vsel %vm1471_vm1, %v1437_v58, %v1470_v56 }
 0x36e   : > { %v2134_v63 = vpop.eup %2133  ;;  %v1446_v0 = vsel %vm1400_vm13, %v1445_v59, %v1441_v55  ;;  %v1454_v38 = vrot.slane %v2132_v60, %v3192_v24 }
 0x36f   : > { %v1459_v1 = vrot.slane %v2134_v63, %v3190_v22  ;;  %v1474_v2 = vsel %vm1473_vm2, %v1446_v0, %v1472_v18 }
 0x370   : > { %v1455_v3 = vsel %vm1400_vm13, %v1454_v38, %v1450_v62 }
 0x371   : > { %v1464_v6 = vsel %vm1400_vm13, %v1463_v61, %v1459_v1  ;;  %v1476_v7 = vsel %vm1475_vm3, %v1455_v3, %v1474_v2 }
 0x372   : > { %v1478_v11 = vsel %vm1477_vm4, %v1464_v6, %v1476_v7 }
 0x373   : > { %1481 = vst.msk [vmem:[%s466_s3] sm:$0xff] %vm1480_vm5, %v1478_v11 }
 0x374   : > { %2322 = shalt.err (!%p2319_p13)
}
 0x375   : > { %s2323_s26 = scalar_lea.hbm %s3225_s28, 128  ;;  %s2327_s16 = scalar_lea.hbm %s3418_s1, 512 }
 0x376   : > { %p2324_p11 = scmp.ne.s32.totalorder %s3225_s28, %s2323_s26  ;;  %p2328_p3 = scmp.lt.u32.totalorder %s3225_s28, %s3418_s1 }
 0x377   : > { %p2329_p12 = scmp.lt.u32.totalorder %s2327_s16, %s2323_s26  ;;  %p2331_p5 = scmp.lt.u32.totalorder %s2323_s26, %s3225_s28 }
 0x378   : > { %p2325_p0 = pnand %p2324_p11, %p3419_p10 }
 0x379   : > { %p2330_p4 = por %p2329_p12, %p2328_p3 }
 0x37a   : > { %p2326_p1 = pneg %p2325_p0 }
 0x37b   : > { %p2332_p8 = por %p2331_p5, %p2330_p4 }
 0x37d   : > { %p2333_p2 = pnand %p2332_p8, %p2326_p1 }
 0x37f   : > { %2336 = shalt.err (!%p2333_p2)
}
 0x380   : > { %1904 = dma.vmem_to_hbm [thread:$0]  (%p3419_p10), %s3227_s30, 128, %s3225_s28, %s1483_s4  }
 0x381 PF: > { %p1937_p9 = scmp.ge.s32.totalorder %s2471_s15, 2  ;;  %s1510_s21 = sand.u32 1, %s2443_s8  }
 0x382   : > { %p3420_p7 = scmp.ne.s32.totalorder %s3384_s22, 0  ;;  %s1511_s13 = scalar_lea.sflag [#allocation5], %s1510_s21 }
 0x384   : > { %p1927_p6 = pnand %p1937_p9, %p3420_p7 }
 0x386   : > { %2414 = dma.done.wait (!%p1927_p6), %s1511_s13, 128  }
 0x387   : > { %2416 = vsyncadd (!%p1927_p6), %s1511_s13, 4294967168  ;;  %s30_s15 = sadd.s32 1, %s2471_s15   ;;  %s3422_s26 = sld [smem:[#allocation22_spill]] }
 0x388   : > { %p3256_p13 = scmp.ge.s32.totalorder %s30_s15, 6   ;;  %s3423_s27 = sld [smem:[#allocation23_spill]] }
 0x389   : > { %s3424_s12 = sld [smem:[#allocation24_spill]]  ;;  %s3425_s0 = smov %s2690_s29 }
 0x38a   : > { %s3426_s3 = sld [smem:[#allocation35_spill]]  ;;  %s3427_s11 = sld [smem:[#allocation27_spill]] }
 0x38b   : > { %s3428_s22 = sld [smem:[#allocation28_spill]]  ;;  %s3429_s13 = sld [smem:[#allocation30_spill]] }
 0x38c   : > { %s3430_s24 = sld [smem:[#allocation31_spill]]  ;;  %s3432_s28 = smov %s3456_s23 }
 0x38d   : > { %s3434_s30 = smov %s2439_s6  ;;  %s3435_s6 = smov %s3425_s0 }
 0x38e   : > { %s3436_s8 = smov %s2447_s9  ;;  %s3437_s9 = smov %s2451_s10 }
 0x38f   : > { %s3433_s29 = smov %s3424_s12  ;;  %29 = sbr.rel (!%p3256_p13) target bundleno = 22 (0x16), region = 131 }
 0x390   : > { %s3438_s10 = smov %s3426_s3 }
 0x391   : > { %s3439_s12 = smov %s3428_s22 }
 0x392   : > { %s3440_s14 = smov %s3430_s24 }
 0x396   :  { %1516 = vsyncpa [#allocation4], 1 }
 0x397   :  { %1518 = vsyncpa [#allocation4 + $0x1], 1 }
 0x398   :  { %1519 = vsyncpa [#allocation7], 1 }
 0x399   :  { %1521 = vsyncpa [#allocation7 + $0x1], 1 }
 0x39a   :  { %1522 = vsyncpa [#allocation10], 1 }
 0x39b   :  { %1523 = vsyncpa [#allocation13], 1 }
 0x39c   :  { %1524 = vsyncpa [#allocation5], 1 }
 0x39d   :  { %1526 = vsyncpa [#allocation5 + $0x1], 1 }

</bundles_post_ra>
